<compile_context>
chip_gen: v7x
topology: tpu7x:2x2x1
jax: 0.10.0
libtpu: 0.0.40
codegen_flags: <defaults>
</compile_context>

<pallas_src>
import functools

import jax
import jax.numpy as jnp
from jax import lax
from jax.experimental import pallas as pl
from jax.experimental.pallas import tpu as pltpu


# ----------------------------- Pallas kernel ---------------------------------
def _backsub_kernel(uw_ref, lw_ref, lb_ref, ub_ref, bias_ref, out_ref, acc_ref):
    k = pl.program_id(1)                      # reduction axis (over N tiles), last in grid

    @pl.when(k == 0)
    def _():
        acc_ref[...] = jnp.zeros_like(acc_ref)

    # Resident bound vectors: (num_k_tiles, tk) in VMEM; pick row k (sublane index, cheap).
    lb = lb_ref[pl.ds(k, 1), :]               # (1, tk) f32
    ub = ub_ref[pl.ds(k, 1), :]               # (1, tk) f32

    w_dtype = uw_ref.dtype
    c = ((ub + lb) * 0.5).astype(w_dtype)     # center  (cast to weight dtype -> MXU operand)
    r = ((ub - lb) * 0.5).astype(w_dtype)     # radius >= 0

    uw = uw_ref[...]                          # (tm, tk) weight tiles in native dtype (no upcast)
    lw = lw_ref[...]

    # Contract on the last axis of both operands: (1, tk) x (tm, tk) -> (1, tm), f32 accumulate.
    dims = (((1,), (1,)), ((), ()))
    dot = functools.partial(lax.dot_general, dimension_numbers=dims,
                            preferred_element_type=jnp.float32)

    upper = dot(c, uw) + dot(r, jnp.abs(uw))  # (1, tm) f32
    lower = dot(c, lw) - dot(r, jnp.abs(lw))  # (1, tm) f32

    # Single full-ref accumulator update (avoids two masked partial stores per step).
    acc_ref[...] += jnp.concatenate([lower, upper], axis=0)     # (2, tm)

    @pl.when(k == pl.num_programs(1) - 1)
    def _():
        out_ref[...] = acc_ref[...] + bias_ref[...]             # (2, tm): row0 lower, row1 upper


# --------------------------- tiling / budget helpers --------------------------
def _round_up(x, mult):
    return (x + mult - 1) // mult * mult


def _pick_block(dim, target):
    """Largest multiple of 128 that divides `dim` (a 128-multiple) and is <= target."""
    t = max(128, (min(target, dim) // 128) * 128)
    while dim % t:
        t -= 128
    return t


def _vmem_limit_bytes():
    """Generation-aware scoped-VMEM budget (v5e/v6e: 128 MiB parts, v7x: 64 MiB)."""
    try:
        cap = int(pltpu.get_tpu_info().vmem_capacity_bytes)
    except Exception:
        cap = 64 << 20                         # conservative (v7x-sized) fallback
    return min(int(cap * 0.8), 100 << 20)


# ------------------------------- Module --------------------------------------
class AbstractInputPallas:
    """JAX/Pallas port of AbstractInput."""
    # TODO(synk): Bounds/BackBounds are plain data containers in the original; represented here
    # as separate arrays / tuples (no kernel needed).

    def forward(self, lower_bound, upper_bound):
        # torch.flatten -> pure reshape glue, no kernel needed.
        self.lowerBound = jnp.ravel(lower_bound)
        self.upperBound = jnp.ravel(upper_bound)
        return self.lowerBound, self.upperBound

    def backsubstitution(self, lowerBoundWeights, upperBoundWeights,
                         lowerBoundBias, upperBoundBias,
                         *, block_m=512, block_n=4096):
        n = self.lowerBound.shape[0]
        m = upperBoundWeights.shape[0]
        assert upperBoundWeights.shape == (m, n)
        assert lowerBoundWeights.shape == (m, n)
        assert upperBoundWeights.dtype == lowerBoundWeights.dtype

        f32 = jnp.float32
        m_pad = _round_up(m, 128)
        n_pad = _round_up(n, 128)

        # Pad to 128 multiples so tiling / double-buffering survives unaligned shapes.
        # Zero-padded columns see zero bounds (contribute 0); zero-padded rows are sliced off.
        uw, lw = upperBoundWeights, lowerBoundWeights
        if (m_pad, n_pad) != (m, n):
            uw = jnp.pad(uw, ((0, m_pad - m), (0, n_pad - n)))
            lw = jnp.pad(lw, ((0, m_pad - m), (0, n_pad - n)))
        lb = jnp.pad(self.lowerBound.astype(f32), (0, n_pad - n))
        ub = jnp.pad(self.upperBound.astype(f32), (0, n_pad - n))
        bias = jnp.stack([jnp.pad(lowerBoundBias.astype(f32), (0, m_pad - m)),
                          jnp.pad(upperBoundBias.astype(f32), (0, m_pad - m))], axis=0)  # (2, M)

        vmem_limit = _vmem_limit_bytes()
        elt = jnp.dtype(uw.dtype).itemsize

        tm = _pick_block(m_pad, block_m)
        if m_pad // tm < 2 and m_pad >= 256:
            # >=2 parallel M tiles so v7x's 2 TensorCores both get work (no-op on v5e/v6e).
            tm = _pick_block(m_pad, m_pad // 2)

        # Reduction tile: spend the idle VMEM on bigger tk (2 matrices x 2 pipeline buffers),
        # leaving headroom for the in-kernel |W| temporaries.
        max_tk = (int(vmem_limit * 0.5) // (4 * tm * elt)) // 128 * 128
        tk = _pick_block(n_pad, max(128, min(block_n, max_tk)))

        gm, gk = m_pad // tm, n_pad // tk
        lb2 = lb.reshape(gk, tk)               # resident bound vectors, row per reduction tile
        ub2 = ub.reshape(gk, tk)

        out = pl.pallas_call(
            _backsub_kernel,
            out_shape=jax.ShapeDtypeStruct((2, m_pad), f32),
            grid_spec=pltpu.PrefetchScalarGridSpec(
                num_scalar_prefetch=0,
                grid=(gm, gk),                                     # M parallel x N reduction(last)
                in_specs=[
                    pl.BlockSpec((tm, tk), lambda i, k: (i, k)),   # UW  (M, N), native dtype/layout
                    pl.BlockSpec((tm, tk), lambda i, k: (i, k)),   # LW  (M, N), native dtype/layout
                    pl.BlockSpec((gk, tk), lambda i, k: (0, 0)),   # lb  resident (gk, tk)
                    pl.BlockSpec((gk, tk), lambda i, k: (0, 0)),   # ub  resident (gk, tk)
                    pl.BlockSpec((2, tm), lambda i, k: (0, i)),    # stacked bias (2, M)
                ],
                out_specs=pl.BlockSpec((2, tm), lambda i, k: (0, i)),
                scratch_shapes=[pltpu.VMEM((2, tm), f32)],         # running accumulator
            ),
            compiler_params=pltpu.CompilerParams(
                dimension_semantics=("parallel", "arbitrary"),
                vmem_limit_bytes=vmem_limit,
            ),
        )(uw, lw, lb2, ub2, bias)

        return out[0, :m], out[1, :m]          # (lower, upper), each shape (M,)


# ------------------------------ Reference -------------------------------------
def _backsub_ref(lb, ub, lw, uw, lbias, ubias):
    upper = (jnp.where(uw > 0, uw, 0.0) @ ub
             + jnp.where(uw < 0, uw, 0.0) @ lb + ubias)
    lower = (jnp.where(lw > 0, lw, 0.0) @ lb
             + jnp.where(lw < 0, lw, 0.0) @ ub + lbias)
    return lower, upper


if __name__ == "__main__":
    key = jax.random.PRNGKey(0)
    kx, kuw, klw, kub, klb = jax.random.split(key, 5)

    # Small "image" bounds: NCHW (1, 4, 16, 16) -> flattened N = 1024.
    C, H, W = 4, 16, 16
    N = C * H * W          # 1024 flattened input dim
    M = 512                # number of back-substituted output neurons
    eps = 0.1

    x = jax.random.normal(kx, (1, C, H, W), dtype=jnp.float32)
    layer = AbstractInputPallas()
    lb_flat, ub_flat = layer.forward(x - eps, x + eps)
    assert lb_flat.shape == (N,) and ub_flat.shape == (N,)

    uw_f32 = jax.random.normal(kuw, (M, N), dtype=jnp.float32)
    lw_f32 = jax.random.normal(klw, (M, N), dtype=jnp.float32)
    ub_bias = jax.random.normal(kub, (M,), dtype=jnp.float32)
    lb_bias = jax.random.normal(klb, (M,), dtype=jnp.float32)

    # --- 1) f32 weights, forced small tiles -> exercises the pipelined (2 x 4) grid + accumulator.
    lo, up = layer.backsubstitution(lw_f32, uw_f32, lb_bias, ub_bias,
                                    block_m=256, block_n=256)
    lo, up = jax.block_until_ready((lo, up))
    ref_lo, ref_up = _backsub_ref(lb_flat, ub_flat, lw_f32, uw_f32, lb_bias, ub_bias)
    assert lo.shape == (M,) and up.shape == (M,)
    # center/radius reformulation changes summation order -> allow ulp-scale slack.
    assert jnp.allclose(lo, ref_lo, atol=1e-2, rtol=1e-3), float(jnp.max(jnp.abs(lo - ref_lo)))
    assert jnp.allclose(up, ref_up, atol=1e-2, rtol=1e-3), float(jnp.max(jnp.abs(up - ref_up)))

    # --- 2) bf16 weights (recommended HBM/MXU dtype), auto tile selection.
    uw_bf = uw_f32.astype(jnp.bfloat16)
    lw_bf = lw_f32.astype(jnp.bfloat16)
    lo_b, up_b = layer.backsubstitution(lw_bf, uw_bf, lb_bias, ub_bias)
    lo_b, up_b = jax.block_until_ready((lo_b, up_b))
    ref_lo_b, ref_up_b = _backsub_ref(lb_flat, ub_flat,
                                      lw_bf.astype(jnp.float32), uw_bf.astype(jnp.float32),
                                      lb_bias, ub_bias)
    assert jnp.allclose(lo_b, ref_lo_b, atol=0.5, rtol=5e-2), \
        float(jnp.max(jnp.abs(lo_b - ref_lo_b)))
    assert jnp.allclose(up_b, ref_up_b, atol=0.5, rtol=5e-2), \
        float(jnp.max(jnp.abs(up_b - ref_up_b)))

    # --- 3) unaligned shapes (M=200, N=300) -> exercises the 128-padding path.
    layer2 = AbstractInputPallas()
    x2 = jax.random.normal(kx, (1, 3, 10, 10), dtype=jnp.float32)
    lb2, ub2 = layer2.forward(x2 - eps, x2 + eps)
    k2a, k2b, k2c, k2d = jax.random.split(kuw, 4)
    uw2 = jax.random.normal(k2a, (200, 300), dtype=jnp.float32)
    lw2 = jax.random.normal(k2b, (200, 300), dtype=jnp.float32)
    ubb2 = jax.random.normal(k2c, (200,), dtype=jnp.float32)
    lbb2 = jax.random.normal(k2d, (200,), dtype=jnp.float32)
    lo2, up2 = layer2.backsubstitution(lw2, uw2, lbb2, ubb2)
    lo2, up2 = jax.block_until_ready((lo2, up2))
    rlo2, rup2 = _backsub_ref(lb2, ub2, lw2, uw2, lbb2, ubb2)
    assert lo2.shape == (200,) and up2.shape == (200,)
    assert jnp.allclose(lo2, rlo2, atol=1e-2, rtol=1e-3), float(jnp.max(jnp.abs(lo2 - rlo2)))
    assert jnp.allclose(up2, rup2, atol=1e-2, rtol=1e-3), float(jnp.max(jnp.abs(up2 - rup2)))

    print("KERNEL_OK")
</pallas_src>

<mosaic_0001>
module attributes {stable_mosaic.version = 11 : i64} {
  func.func @_backsub_kernel(%arg0: i32, %arg1: i32, %arg2: memref<256x256xf32, #tpu.memory_space<vmem>>, %arg3: memref<256x256xf32, #tpu.memory_space<vmem>>, %arg4: memref<4x256xf32, #tpu.memory_space<vmem>>, %arg5: memref<4x256xf32, #tpu.memory_space<vmem>>, %arg6: memref<2x256xf32, #tpu.memory_space<vmem>>, %arg7: memref<2x256xf32, #tpu.memory_space<vmem>>, %arg8: memref<2x256xf32, #tpu.memory_space<vmem>>) attributes {dimension_semantics = [#tpu.dimension_semantics<parallel>, #tpu.dimension_semantics<arbitrary>], iteration_bounds = array<i64: 2, 4>, scalar_prefetch = 0 : i64, scratch_operands = 1 : i64, tpu.core_type = #tpu.core_type<tc>, window_params = [{transform_indices = @transform_0, window_bounds = array<i64: 256, 256>}, {transform_indices = @transform_1, window_bounds = array<i64: 256, 256>}, {pipeline_mode = #tpu.pipeline_mode<synchronous>, transform_indices = @transform_2, window_bounds = array<i64: 4, 256>}, {pipeline_mode = #tpu.pipeline_mode<synchronous>, transform_indices = @transform_3, window_bounds = array<i64: 4, 256>}, {transform_indices = @transform_4, window_bounds = array<i64: 2, 256>}, {transform_indices = @transform_5, window_bounds = array<i64: 2, 256>}]} {
    %c0_i32 = arith.constant 0 : i32
    %0 = arith.cmpi eq, %arg1, %c0_i32 : i32
    %1 = arith.extui %0 : i1 to i32
    %c0_i32_0 = arith.constant 0 : i32
    %2 = arith.cmpi ne, %1, %c0_i32_0 : i32
    scf.if %2 {
      %cst_16 = arith.constant 0.000000e+00 : f32
      %30 = vector.broadcast %cst_16 : f32 to vector<2x256xf32>
      %c0_17 = arith.constant 0 : index
      %c0_18 = arith.constant 0 : index
      %31 = vector.load %arg8[%c0_17, %c0_18] : memref<2x256xf32, #tpu.memory_space<vmem>>, vector<2x256xf32>
      tpu.vector_store %arg8[%c0_17, %c0_18], %30 {strides = array<i32>} : memref<2x256xf32, #tpu.memory_space<vmem>>, vector<2x256xf32>,
    } else {
    }
    %3 = arith.index_cast %arg1 : i32 to index
    %c0 = arith.constant 0 : index
    %4 = vector.load %arg4[%3, %c0] : memref<4x256xf32, #tpu.memory_space<vmem>>, vector<1x256xf32>
    %5 = arith.index_cast %arg1 : i32 to index
    %c0_1 = arith.constant 0 : index
    %6 = vector.load %arg5[%5, %c0_1] : memref<4x256xf32, #tpu.memory_space<vmem>>, vector<1x256xf32>
    %7 = arith.addf %6, %4 : vector<1x256xf32>
    %cst = arith.constant 5.000000e-01 : f32
    %8 = vector.broadcast %cst : f32 to vector<1x256xf32>
    %9 = arith.mulf %7, %8 : vector<1x256xf32>
    %10 = arith.subf %6, %4 : vector<1x256xf32>
    %cst_2 = arith.constant 5.000000e-01 : f32
    %11 = vector.broadcast %cst_2 : f32 to vector<1x256xf32>
    %12 = arith.mulf %10, %11 : vector<1x256xf32>
    %c0_3 = arith.constant 0 : index
    %c0_4 = arith.constant 0 : index
    %13 = vector.load %arg2[%c0_3, %c0_4] : memref<256x256xf32, #tpu.memory_space<vmem>>, vector<256x256xf32>
    %c0_5 = arith.constant 0 : index
    %c0_6 = arith.constant 0 : index
    %14 = vector.load %arg3[%c0_5, %c0_6] : memref<256x256xf32, #tpu.memory_space<vmem>>, vector<256x256xf32>
    %cst_7 = arith.constant dense<0.000000e+00> : vector<1x256xf32>
    %15 = tpu.matmul %9, %13, %cst_7 {dimension_numbers = #tpu.dot_dimension_numbers<[1], [1], [0], [0], [0, 0, 1, 0], [], []>} : vector<1x256xf32>, vector<256x256xf32>, vector<1x256xf32> -> vector<1x256xf32>
    %16 = math.absf %13 : vector<256x256xf32>
    %cst_8 = arith.constant dense<0.000000e+00> : vector<1x256xf32>
    %17 = tpu.matmul %12, %16, %cst_8 {dimension_numbers = #tpu.dot_dimension_numbers<[1], [1], [0], [0], [0, 0, 1, 0], [], []>} : vector<1x256xf32>, vector<256x256xf32>, vector<1x256xf32> -> vector<1x256xf32>
    %18 = arith.addf %15, %17 : vector<1x256xf32>
    %cst_9 = arith.constant dense<0.000000e+00> : vector<1x256xf32>
    %19 = tpu.matmul %9, %14, %cst_9 {dimension_numbers = #tpu.dot_dimension_numbers<[1], [1], [0], [0], [0, 0, 1, 0], [], []>} : vector<1x256xf32>, vector<256x256xf32>, vector<1x256xf32> -> vector<1x256xf32>
    %20 = math.absf %14 : vector<256x256xf32>
    %cst_10 = arith.constant dense<0.000000e+00> : vector<1x256xf32>
    %21 = tpu.matmul %12, %20, %cst_10 {dimension_numbers = #tpu.dot_dimension_numbers<[1], [1], [0], [0], [0, 0, 1, 0], [], []>} : vector<1x256xf32>, vector<256x256xf32>, vector<1x256xf32> -> vector<1x256xf32>
    %22 = arith.subf %19, %21 : vector<1x256xf32>
    %c0_11 = arith.constant 0 : index
    %c0_12 = arith.constant 0 : index
    %23 = vector.load %arg8[%c0_11, %c0_12] : memref<2x256xf32, #tpu.memory_space<vmem>>, vector<2x256xf32>
    %24 = tpu.concatenate %22, %18 in 0 : vector<1x256xf32>, vector<1x256xf32> -> vector<2x256xf32>
    %25 = arith.addf %23, %24 : vector<2x256xf32>
    %c0_13 = arith.constant 0 : index
    %c0_14 = arith.constant 0 : index
    %26 = vector.load %arg8[%c0_13, %c0_14] : memref<2x256xf32, #tpu.memory_space<vmem>>, vector<2x256xf32>
    tpu.vector_store %arg8[%c0_13, %c0_14], %25 {strides = array<i32>} : memref<2x256xf32, #tpu.memory_space<vmem>>, vector<2x256xf32>,
    %c3_i32 = arith.constant 3 : i32
    %27 = arith.cmpi eq, %arg1, %c3_i32 : i32
    %28 = arith.extui %27 : i1 to i32
    %c0_i32_15 = arith.constant 0 : i32
    %29 = arith.cmpi ne, %28, %c0_i32_15 : i32
    scf.if %29 {
      %c0_16 = arith.constant 0 : index
      %c0_17 = arith.constant 0 : index
      %30 = vector.load %arg8[%c0_16, %c0_17] : memref<2x256xf32, #tpu.memory_space<vmem>>, vector<2x256xf32>
      %c0_18 = arith.constant 0 : index
      %c0_19 = arith.constant 0 : index
      %31 = vector.load %arg6[%c0_18, %c0_19] : memref<2x256xf32, #tpu.memory_space<vmem>>, vector<2x256xf32>
      %32 = arith.addf %30, %31 : vector<2x256xf32>
      %c0_20 = arith.constant 0 : index
      %c0_21 = arith.constant 0 : index
      %33 = vector.load %arg7[%c0_20, %c0_21] : memref<2x256xf32, #tpu.memory_space<vmem>>, vector<2x256xf32>
      tpu.vector_store %arg7[%c0_20, %c0_21], %32 {strides = array<i32>} : memref<2x256xf32, #tpu.memory_space<vmem>>, vector<2x256xf32>,
    } else {
    }
    return
  }
  func.func @transform_0(%arg0: i32, %arg1: i32) -> (i32, i32) {
    %c0_i32 = arith.constant 0 : i32
    return %arg0, %arg1 : i32, i32
  }
  func.func @transform_1(%arg0: i32, %arg1: i32) -> (i32, i32) {
    %c0_i32 = arith.constant 0 : i32
    return %arg0, %arg1 : i32, i32
  }
  func.func @transform_2(%arg0: i32, %arg1: i32) -> (i32, i32) {
    %c0_i32 = arith.constant 0 : i32
    %c0_i32_0 = arith.constant 0 : i32
    %c0_i32_1 = arith.constant 0 : i32
    return %c0_i32, %c0_i32_0 : i32, i32
  }
  func.func @transform_3(%arg0: i32, %arg1: i32) -> (i32, i32) {
    %c0_i32 = arith.constant 0 : i32
    %c0_i32_0 = arith.constant 0 : i32
    %c0_i32_1 = arith.constant 0 : i32
    return %c0_i32, %c0_i32_0 : i32, i32
  }
  func.func @transform_4(%arg0: i32, %arg1: i32) -> (i32, i32) {
    %c0_i32 = arith.constant 0 : i32
    %c0_i32_0 = arith.constant 0 : i32
    return %c0_i32, %arg0 : i32, i32
  }
  func.func @transform_5(%arg0: i32, %arg1: i32) -> (i32, i32) {
    %c0_i32 = arith.constant 0 : i32
    %c0_i32_0 = arith.constant 0 : i32
    return %c0_i32, %arg0 : i32, i32
  }
}

</mosaic_0001>

<bundles_post_ra>
// kernel: tpu_custom_call.1
= control target key start
LH: loop header
LB: loop body
LE: loop exit
PB: predicated region body
PF: predicated region fallthrough
CT: control target
= control target key end

     0   :  { %s3014_s0 = inlined_call_operand.hbm [shape: f32[512,1024], index: 0, kind: input, shape index: {}]   ;;  %s3015_s1 = inlined_call_operand.hbm [shape: f32[512,1024], index: 1, kind: input, shape index: {}]   ;;  %s3016_s2 = inlined_call_operand.hbm [shape: f32[4,256], index: 2, kind: input, shape index: {}]   ;;  %s3017_s3 = inlined_call_operand.hbm [shape: f32[4,256], index: 3, kind: input, shape index: {}]   ;;  %s3018_s4 = inlined_call_operand.hbm [shape: f32[2,512], index: 4, kind: input, shape index: {}]   ;;  %s3019_s5 = inlined_call_operand.hbm [shape: f32[2,512], index: 5, kind: output, shape index: {}]  }
   0x1   :  { %3085 = sst [smem:[#allocation87_spill]] %s3014_s0 }
   0x2   :  { %3086 = sst [smem:[#allocation88_spill]] %s3016_s2 }
   0x3   :  { %3087 = sst [smem:[#allocation89_spill]] %s3018_s4 }
   0x4   :  { %3088 = sst [smem:[#allocation90_spill]] %s3019_s5 }
   0x5   :  { %10 = vsyncpa [#allocation4], 0 }
   0x6   :  { %12 = vsyncpa [#allocation4 + $0x1], 0 }
   0x7   :  { %13 = vsyncpa [#allocation7], 0 }
   0x8   :  { %15 = vsyncpa [#allocation7 + $0x1], 0 }
   0x9   :  { %16 = vsyncpa [#allocation10], 0 }
   0xa   :  { %17 = vsyncpa [#allocation5], 0 }
   0xb   :  { %19 = vsyncpa [#allocation5 + $0x1], 0  ;;  %s1919_s18 = smov 0   ;;  %s1921_s19 = smov 0  }
   0xc   :  { %s1923_s20 = smov 0   ;;  %s1925_s21 = smov 0  }
   0xd   :  { %s1927_s22 = smov 0   ;;  %s1929_s23 = smov 0  }
   0xe   :  { %s1931_s24 = smov 0   ;;  %s1933_s25 = smov 0  }
   0xf   :  { %s1935_s26 = smov 0   ;;  %s1937_s27 = smov 0  }
  0x10   :  { %s1939_s28 = smov 0  }
  0x11 LB: > { %3089 = sst [smem:[#allocation19_spill]] %s1836_s18  ;;  %s1973_s29 = sadd.s32 4294967295, %s1876_s28   ;;  %s1876_s28 = sphi %s1939_s28, %s25_s28   ;;  %s1872_s27 = sphi %s1937_s27, %s3295_s27   ;;  %s1868_s26 = sphi %s1935_s26, %s3289_s26   ;;  %s1864_s25 = sphi %s1933_s25, %s3294_s25   ;;  %s1860_s24 = sphi %s1931_s24, %s3288_s24   ;;  %s1856_s23 = sphi %s1929_s23, %s3287_s23   ;;  %s1852_s22 = sphi %s1927_s22, %s3286_s22   ;;  %s1848_s21 = sphi %s1925_s21, %s3285_s21   ;;  %s1844_s20 = sphi %s1923_s20, %s3293_s20   ;;  %s1840_s19 = sphi %s1921_s19, %s3292_s19   ;;  %s1836_s18 = sphi %s1919_s18, %s3291_s18  }
  0x12   : > { %3090 = sst [smem:[#allocation20_spill]] %s1852_s22  ;;  %s1157_s30 = sadd.s32 4294967294, %s1876_s28  }
  0x13   : > { %3091 = sst [smem:[#allocation21_spill]] %s1856_s23  ;;  %p53_p0 = scmp.ne.s32.totalorder %s1856_s23, %s1852_s22 }
  0x14   : > { %3092 = sst [smem:[#allocation22_spill]] %s1860_s24  ;;  %p3023_p1 = scmp.eq.s32.totalorder %s1876_s28, 0 }
  0x15   : > { %3093 = sst [smem:[#allocation23_spill]] %s1864_s25  ;;  %p59_p2 = scmp.ne.s32.totalorder %s1852_s22, %s1848_s21 }
  0x16   : > { %3094 = sst [smem:[#allocation24_spill]] %s1868_s26  ;;  %p3020_p3 = scmp.eq.s32.totalorder %s1973_s29, 0 }
  0x17   : > { %p155_p4 = scmp.ne.s32.totalorder %s1840_s19, %s1836_s18  ;;  %p1986_p5 = por %p3023_p1, %p53_p0 }
  0x18   : > { %p1993_p7 = por %p3020_p3, %p59_p2  ;;  %p185_p9 = scmp.eq.s32.totalorder %s1157_s30, 7 }
  0x19   : > { %p1999_p8 = por %p155_p4, %p3020_p3  ;;  %p1158_p10 = scmp.ge.s32.totalorder %s1876_s28, 1 }
  0x1a   : > { %s3096_s8 = scalar_select %p1993_p7, 1, 0 }
  0x1b   : > { %s3098_s9 = scalar_select %p1999_p8, 1, 0 }
  0x1c   : > { %3097 = sst [smem:[#allocation25_spill]] %s3096_s8  ;;  %p192_p11 = scmp.lt.s32.totalorder %s1876_s28, 9 }
  0x1d   : > { %3099 = sst [smem:[#allocation26_spill]] %s3098_s9  ;;  %p2005_p12 = por %p185_p9, %p155_p4 }
  0x1e   : > { %p2009_p13 = pnand %p1158_p10, %p192_p11  ;;  %s1878_s12 = smov [#allocation8]  }
  0x1f   : > { %s3100_s10 = scalar_select %p2005_p12, 1, 0 }
  0x20   : > { %s3102_s11 = scalar_select %p2009_p13, 1, 0 }
  0x21   : > { %3101 = sst [smem:[#allocation27_spill]] %s3100_s10  ;;  %s205_s13 = sshll.u32 %s1878_s12, 4  ;;  %s206_s13 = int_to_ptr.vmem [resolvable:$true] %s205_s13 }
  0x22   : > { %3103 = sst [smem:[#allocation28_spill]] %s3102_s11  ;;  %p1470_p0 = pneg %p2009_p13 }
  0x23   : > { %p3022_p2 = scmp.lt.s32.totalorder %s1876_s28, 8  ;;  %s3106_s2 = sld [smem:[#allocation88_spill]] }
  0x24   : > { %p2018_p6 = pnand %p1470_p0, %p3020_p3 }
  0x25   : > { %p2026_p4 = pnand %p3022_p2, %p1986_p5 }
  0x26   : > { %p3035_p10 = pneg %p2018_p6 }
  0x27   : > { %s3105_s15 = scalar_select %p2026_p4, 1, 0 }
  0x29   : > { %s1592_s21 = scalar_lea.hbm %s3106_s2, 128 }
  0x2a   : > { %p1593_p9 = scmp.ne.s32.totalorder %s3106_s2, %s1592_s21  ;;  %p1599_p5 = scmp.lt.u32.totalorder %s1592_s21, %s3106_s2 }
  0x2c   : > { %p1595_p11 = pnand %p3035_p10, %p1593_p9 }
  0x2e   : > { %p1596_p0 = pneg %p1595_p11 }
  0x30   : > { %p1601_p3 = pnand %p1599_p5, %p1596_p0 }
  0x32   : > { %1604 = shalt.err (!%p1601_p3)
}
  0x33   : > { %s1605_s10 = scalar_lea.vmem %s206_s13, 128  ;;  %p1613_p8 = scmp.lt.s32.totalorder %s206_s13, %s206_s13 }
  0x34   : > { %p1606_p2 = scmp.ne.s32.totalorder %s206_s13, %s1605_s10  ;;  %p1614_p7 = scmp.lt.s32.totalorder %s1605_s10, %s1605_s10 }
  0x36   : > { %p1608_p1 = pnand %p1606_p2, %p3035_p10  ;;  %p1615_p13 = por %p1614_p7, %p1613_p8 }
  0x38   : > { %p1609_p12 = pneg %p1608_p1 }
  0x3a   : > { %p1616_p4 = pnand %p1615_p13, %p1609_p12 }
  0x3c   : > { %1619 = shalt.err (!%p1616_p4)
}
  0x3d   : > { %1473 = dma.hbm_to_vmem [thread:$0]  (!%p2018_p6), %s3106_s2, 128, %s206_s13, [#allocation7]  }
  0x3e   : > { %s34_s6 = sadd.s32 1, %s1868_s26  ;;  %s37_s10 = sadd.s32 1, %s1872_s27 }
  0x3f   : > { %p35_p1 = scmp.ge.s32.totalorder %s34_s6, 4  ;;  %s229_s30 = sand.u32 1, %s1856_s23  }
  0x40   : > { %s2061_s7 = sshll.u32 %s229_s30, 9  ;;  %s1164_s16 = sshll.u32 %s1868_s26, 1 }
  0x41   : > { %s3297_s6 = smov (%p35_p1, %s34_s6), 0  ;;  %s3299_s10 = smov (!%p35_p1, %s37_s10), %s1872_s27 }
  0x42   : > { %3107 = sst [smem:[#allocation29_spill]] %s3297_s6  ;;  %s42_s12 = ssub.s32 %s1868_s26, %s3297_s6 }
  0x43   : > { %p39_p3 = scmp.ge.s32.totalorder %s3299_s10, 2  ;;  %s1191_s13 = sshll.u32 %s1872_s27, 8 }
  0x44   : > { %s2067_s17 = sadd.s32 %s1191_s13, %s1164_s16  ;;  %s231_s21 = scalar_lea.vmem [#allocation3], %s2061_s7 }
  0x45   : > { %s3301_s10 = smov (%p39_p3, %s3299_s10), 0  ;;  %s241_s2 = sshll.u32 %s231_s21, 4  ;;  %s2083_s2 = int_to_ptr.vmem [resolvable:$true] %s241_s2 }
  0x46   : > { %3108 = sst [smem:[#allocation30_spill]] %s3301_s10  ;;  %s2072_s18 = ssub.s32 %s1872_s27, %s3301_s10 }
  0x47   : > { %s3033_s30 = sshll.u32 %s2067_s17, 7  ;;  %s43_s6 = sor.u32 %s42_s12, %s2072_s18 }
  0x48   : > { %s3109_s0 = sld [smem:[#allocation87_spill]]  ;;  %p44_p7 = scmp.eq.s32.totalorder %s43_s6, 0 }
  0x49   : > { %s3110_s16 = sadd.s32 1, %s1856_s23  ;;  %s3112_s13 = sand.u32 1, %s1876_s28  }
  0x4a   : > { %s2088_s21 = scalar_select %p44_p7, %s1856_s23, %s3110_s16  }
  0x4b   : > { %s2092_s10 = scalar_lea.sflag [#allocation4], %s3112_s13  ;;  %p3113_p12 = scmp.ne.s32.totalorder %s3105_s15, 0 }
  0x4c   : > { %3111 = sst [smem:[#allocation31_spill]] %s2088_s21 }
  0x4d   : > { %p3044_p13 = pneg %p3113_p12 }
  0x4e   : > { %s2081_s25 = scalar_lea.hbm %s3109_s0, %s3033_s30  ;;  %s1625_s6 = scalar_lea.hbm %s3109_s0, 65536 }
  0x4f   : > { %s1620_s12 = scalar_lea.hbm %s2081_s25, 8192  ;;  %p1626_p9 = scmp.lt.u32.totalorder %s2081_s25, %s3109_s0 }
  0x50   : > { %p1621_p8 = scmp.ne.s32.totalorder %s2081_s25, %s1620_s12  ;;  %p1627_p11 = scmp.lt.u32.totalorder %s1625_s6, %s1620_s12 }
  0x51   : > { %p1629_p5 = scmp.lt.u32.totalorder %s1620_s12, %s2081_s25 }
  0x52   : > { %p1623_p2 = pnand %p3044_p13, %p1621_p8  ;;  %p1628_p0 = por %p1627_p11, %p1626_p9 }
  0x54   : > { %p1624_p4 = pneg %p1623_p2  ;;  %p1630_p1 = por %p1629_p5, %p1628_p0 }
  0x56   : > { %p1631_p3 = pnand %p1630_p1, %p1624_p4 }
  0x58   : > { %1634 = shalt.err (!%p1631_p3)
}
  0x59   : > { %s1635_s16 = scalar_lea.vmem %s2083_s2, 8192  ;;  %s1879_s13 = smov [#allocation3]  }
  0x5a   : > { %p1636_p7 = scmp.ne.s32.totalorder %s2083_s2, %s1635_s16  ;;  %s1640_s5 = sshll.u32 %s1879_s13, 4  ;;  %s1641_s5 = int_to_ptr.vmem [resolvable:$false] %s1640_s5 }
  0x5b   : > { %s1642_s24 = scalar_lea.vmem %s1641_s5, 16384  ;;  %p1643_p10 = scmp.lt.s32.totalorder %s2083_s2, %s1641_s5 }
  0x5c   : > { %p1638_p8 = pnand %p1636_p7, %p3044_p13  ;;  %p1644_p9 = scmp.lt.s32.totalorder %s1642_s24, %s1635_s16 }
  0x5e   : > { %p1639_p2 = pneg %p1638_p8  ;;  %p1645_p11 = por %p1644_p9, %p1643_p10 }
  0x60   : > { %p1646_p0 = pnand %p1645_p11, %p1639_p2 }
  0x62   : > { %1649 = shalt.err (!%p1646_p0)
}
  0x63   : > { %s1880_s30 = smov 1024   ;;  %s1881_s12 = smov 256  }
  0x64   : > { %s1882_s26 = smov 16   ;;  %s3114_s6 = sshll.u32 %s2067_s17, 7 }
  0x65   : > { %1480 = dma.hbm_to_vmem [thread:$0]  (!%p3113_p12), %s2081_s25, 8192, %s2083_s2, %s2092_s10, %s1880_s30, %s1881_s12, %s1882_s26  }
  0x66   : > { %s2128_s5 = scalar_lea.hbm %s3015_s1, %s3114_s6  ;;  %s255_s24 = scalar_lea.vmem [#allocation6], %s2061_s7 }
  0x67   : > { %s265_s0 = sshll.u32 %s255_s24, 4  ;;  %s1883_s21 = smov [#allocation9]   ;;  %s2131_s0 = int_to_ptr.vmem [resolvable:$true] %s265_s0 }
  0x68   : > { %s216_s23 = sshll.u32 %s1883_s21, 4  ;;  %s1650_s22 = scalar_lea.hbm %s3017_s3, 128  ;;  %s217_s23 = int_to_ptr.vmem [resolvable:$true] %s216_s23 }
  0x69   : > { %p1651_p10 = scmp.ne.s32.totalorder %s3017_s3, %s1650_s22  ;;  %p3115_p4 = pneg %p2018_p6 }
  0x6a   : > { %p1657_p3 = scmp.lt.u32.totalorder %s1650_s22, %s3017_s3 }
  0x6b   : > { %p1653_p5 = pnand %p1651_p10, %p3115_p4 }
  0x6d   : > { %p1654_p1 = pneg %p1653_p5 }
  0x6f   : > { %p1659_p7 = pnand %p1657_p3, %p1654_p1 }
  0x71   : > { %1662 = shalt.err (!%p1659_p7)
}
  0x72   : > { %s1663_s7 = scalar_lea.vmem %s217_s23, 128  ;;  %p3116_p2 = pmov %p3115_p4 }
  0x73   : > { %p1664_p8 = scmp.ne.s32.totalorder %s217_s23, %s1663_s7  ;;  %p1671_p0 = scmp.lt.s32.totalorder %s217_s23, %s217_s23 }
  0x74   : > { %p1672_p13 = scmp.lt.s32.totalorder %s1663_s7, %s1663_s7 }
  0x75   : > { %p1666_p9 = pnand %p1664_p8, %p3116_p2 }
  0x76   : > { %p1673_p12 = por %p1672_p13, %p1671_p0 }
  0x77   : > { %p1667_p11 = pneg %p1666_p9 }
  0x79   : > { %p1674_p4 = pnand %p1673_p12, %p1667_p11 }
  0x7b   : > { %1677 = shalt.err (!%p1674_p4)
}
  0x7c   : > { %1476 = dma.hbm_to_vmem [thread:$0]  (!%p2018_p6), %s3017_s3, 128, %s217_s23, [#allocation10]  }
  0x7d   : > { %s3117_s22 = sand.u32 1, %s1876_s28   ;;  %s1678_s11 = scalar_lea.hbm %s2128_s5, 8192 }
  0x7e   : > { %s2155_s9 = scalar_lea.sflag [#allocation7], %s3117_s22  ;;  %p1679_p10 = scmp.ne.s32.totalorder %s2128_s5, %s1678_s11 }
  0x7f   : > { %p3118_p13 = scmp.ne.s32.totalorder %s3105_s15, 0  ;;  %s1683_s21 = scalar_lea.hbm %s3015_s1, 65536 }
  0x80   : > { %p1684_p3 = scmp.lt.u32.totalorder %s2128_s5, %s3015_s1  ;;  %p1685_p7 = scmp.lt.u32.totalorder %s1683_s21, %s1678_s11 }
  0x81   : > { %p3119_p12 = pneg %p3118_p13  ;;  %p1687_p6 = scmp.lt.u32.totalorder %s1678_s11, %s2128_s5 }
  0x82   : > { %p1686_p8 = por %p1685_p7, %p1684_p3 }
  0x83   : > { %p1681_p5 = pnand %p1679_p10, %p3119_p12 }
  0x84   : > { %p1688_p2 = por %p1687_p6, %p1686_p8 }
  0x85   : > { %p1682_p1 = pneg %p1681_p5 }
  0x87   : > { %p1689_p9 = pnand %p1688_p2, %p1682_p1 }
  0x89   : > { %1692 = shalt.err (!%p1689_p9)
}
  0x8a   : > { %s1693_s23 = scalar_lea.vmem %s2131_s0, 8192  ;;  %p3120_p0 = pmov %p3119_p12 }
  0x8b   : > { %p1694_p11 = scmp.ne.s32.totalorder %s2131_s0, %s1693_s23  ;;  %s1884_s13 = smov [#allocation6]  }
  0x8c   : > { %s1698_s24 = sshll.u32 %s1884_s13, 4  ;;  %s1699_s24 = int_to_ptr.vmem [resolvable:$false] %s1698_s24 }
  0x8d   : > { %p1696_p4 = pnand %p1694_p11, %p3120_p0  ;;  %s1700_s2 = scalar_lea.vmem %s1699_s24, 16384 }
  0x8e   : > { %p1701_p12 = scmp.lt.s32.totalorder %s2131_s0, %s1699_s24  ;;  %p1702_p5 = scmp.lt.s32.totalorder %s1700_s2, %s1693_s23 }
  0x8f   : > { %p1697_p10 = pneg %p1696_p4 }
  0x90   : > { %p1703_p3 = por %p1702_p5, %p1701_p12 }
  0x92   : > { %p1704_p7 = pnand %p1703_p3, %p1697_p10 }
  0x94   : > { %1707 = shalt.err (!%p1704_p7)
}
  0x95   : > { %1483 = dma.hbm_to_vmem [thread:$0]  (!%p3118_p13), %s2128_s5, 8192, %s2131_s0, %s2155_s9, %s1880_s30, %s1881_s12, %s1882_s26  }
  0x96   : > { %p140_p1 = scmp.eq.s32.totalorder %s2072_s18, 0  ;;  %s142_s25 = sadd.s32 1, %s1844_s20 }
  0x97   : > { %p149_p8 = scmp.ne.s32.totalorder %s1844_s20, %s1840_s19  ;;  %p3121_p6 = scmp.eq.s32.totalorder %s1876_s28, 0 }
  0x98   : > { %s2189_s15 = scalar_select %p140_p1, %s1844_s20, %s142_s25  }
  0x99   : > { %p151_p2 = por %p149_p8, %p3121_p6  ;;  %p3122_p9 = scmp.eq.s32.totalorder %s1973_s29, 7 }
  0x9a   : > { %s277_s4 = sand.u32 1, %s1844_s20   ;;  %s1193_s8 = sshll.u32 %s1872_s27, 6 }
  0x9b   : > { %p2195_p11 = por %p3122_p9, %p149_p8  ;;  %s1172_s22 = sshll.u32 %s277_s4, 2 }
  0x9c   : > { %s3124_s17 = sld [smem:[#allocation89_spill]]  ;;  %p3125_p13 = scmp.lt.s32.totalorder %s1876_s28, 8 }
  0x9d   : > { %s3123_s7 = scalar_select %p2195_p11, 1, 0 }
  0x9e   : > { %p2208_p0 = pnand %p3125_p13, %p151_p2  ;;  %s279_s18 = scalar_lea.vmem [#allocation11], %s1172_s22 }
  0x9f   : > { %s287_s30 = sshll.u32 %s279_s18, 4  ;;  %s288_s30 = int_to_ptr.vmem [resolvable:$true] %s287_s30 }
  0xa0   : > { %p1710_p10 = pneg %p2208_p0 }
  0xa2   : > { %s2204_s21 = scalar_lea.hbm %s3124_s17, %s1193_s8  ;;  %s1713_s9 = scalar_lea.hbm %s3124_s17, 128 }
  0xa3   : > { %s1708_s12 = scalar_lea.hbm %s2204_s21, 64  ;;  %p1714_p3 = scmp.lt.u32.totalorder %s2204_s21, %s3124_s17 }
  0xa4   : > { %p1709_p4 = scmp.ne.s32.totalorder %s2204_s21, %s1708_s12  ;;  %p1715_p7 = scmp.lt.u32.totalorder %s1713_s9, %s1708_s12 }
  0xa5   : > { %p1717_p8 = scmp.lt.u32.totalorder %s1708_s12, %s2204_s21 }
  0xa6   : > { %p1711_p12 = pnand %p1710_p10, %p1709_p4  ;;  %p1716_p1 = por %p1715_p7, %p1714_p3 }
  0xa8   : > { %p1712_p5 = pneg %p1711_p12  ;;  %p1718_p6 = por %p1717_p8, %p1716_p1 }
  0xaa   : > { %p1719_p2 = pnand %p1718_p6, %p1712_p5 }
  0xac   : > { %1722 = shalt.err (!%p1719_p2)
}
  0xad   : > { %s1723_s23 = scalar_lea.vmem %s288_s30, 64  ;;  %s1885_s13 = smov [#allocation11]  }
  0xae   : > { %p1724_p9 = scmp.ne.s32.totalorder %s288_s30, %s1723_s23  ;;  %s1728_s24 = sshll.u32 %s1885_s13, 4  ;;  %s1729_s24 = int_to_ptr.vmem [resolvable:$false] %s1728_s24 }
  0xaf   : > { %s1730_s2 = scalar_lea.vmem %s1729_s24, 128  ;;  %p1731_p12 = scmp.lt.s32.totalorder %s288_s30, %s1729_s24 }
  0xb0   : > { %p1726_p13 = pnand %p1724_p9, %p1710_p10  ;;  %p1732_p11 = scmp.lt.s32.totalorder %s1730_s2, %s1723_s23 }
  0xb2   : > { %p1727_p4 = pneg %p1726_p13  ;;  %p1733_p3 = por %p1732_p11, %p1731_p12 }
  0xb4   : > { %p1734_p7 = pnand %p1733_p3, %p1727_p4 }
  0xb6   : > { %1737 = shalt.err (!%p1734_p7)
}
  0xb7   : > { %1486 = dma.hbm_to_vmem [thread:$0]  (!%p2208_p0), %s2204_s21, 64, %s288_s30, %s2092_s10  }
  0xb8   : > { %s3127_s25 = sld [smem:[#allocation28_spill]] }
  0xbe   : > { %p3128_p5 = scmp.ne.s32.totalorder %s3127_s25, 0 }
  0xc0   : > { %296 = sbr.rel (%p3128_p5) target bundleno = 764 (0x2fc), region = 40 }
  0xc7   : > { %s3129_s4 = sld [smem:[#allocation20_spill]]  ;;  %s3130_s8 = sld [smem:[#allocation25_spill]] }
  0xc8   : > { %s298_s22 = sand.u32 1, %s1973_s29  }
  0xc9   : > { %s299_s18 = scalar_lea.sflag [#allocation4], %s298_s22 }
  0xcd   : > { %s300_s11 = sand.u32 1, %s3129_s4   ;;  %p3131_p11 = scmp.ne.s32.totalorder %s3130_s8, 0 }
  0xce   : > { %s1176_s14 = sshll.u32 %s300_s11, 9 }
  0xcf   : > { %s2238_s12 = scalar_lea.vmem [#allocation3], %s1176_s14 }
  0xd0   : > { %1811 = dma.done.wait (%p3131_p11), %s299_s18, 8192  }
  0xd1   : > { %1813 = vsyncadd (%p3131_p11), %s299_s18, 4294959104  ;;  %s308_s0 = scalar_lea.sflag [#allocation7], %s298_s22  ;;  %s2244_s10 = scalar_lea.vmem [#allocation6], %s1176_s14 }
  0xd2   : > { %1815 = dma.done.wait (%p3131_p11), %s308_s0, 8192  }
  0xd3   : > { %1817 = vsyncadd (%p3131_p11), %s308_s0, 4294959104  ;;  %p3132_p0 = scmp.eq.s32.totalorder %s1973_s29, 0 }
  0xd5   : > { %1819 = dma.done.wait (%p3132_p0), [#allocation7], 128   ;;  %p3133_p10 = pmov %p3132_p0 }
  0xd6   : > { %p3134_p1 = pmov %p3132_p0 }
  0xd7   : > { %1821 = vsyncadd (%p3133_p10), [#allocation7], 4294967168 }
  0xd8   : > { %1823 = dma.done.wait (%p3134_p1), [#allocation10], 128   ;;  %p3135_p8 = pmov %p3132_p0 }
  0xd9   : > { %s3136_s21 = sld [smem:[#allocation26_spill]]  ;;  %s326_s30 = sand.u32 1, %s1840_s19  }
  0xda   : > { %1825 = vsyncadd (%p3135_p8), [#allocation10], 4294967168  ;;  %s2261_s26 = sshll.u32 %s326_s30, 2 }
  0xdb   : > { %s328_s5 = scalar_lea.vmem [#allocation11], %s2261_s26 }
  0xdf   : > { %p3137_p6 = scmp.ne.s32.totalorder %s3136_s21, 0 }
  0xe1   : > { %1827 = dma.done.wait (%p3137_p6), %s299_s18, 64  }
  0xe2   : > { %1829 = vsyncadd (%p3137_p6), %s299_s18, 4294967232  ;;  %s364_s9 = scalar_lea.vmem [#allocation12], %s2261_s26  ;;  %s3138_s6 = sld [smem:[#allocation22_spill]] }
  0xe8   : > { %p1182_p2 = scmp.ne.s32.totalorder %s3138_s6, 0 }
  0xe9   : > { %v1886_v0 = vmov (!%p1182_p2), 0.0  }
  0xea   : > { %374 = sbr.rel (%p1182_p2) target bundleno = 241 (0xf1), region = 64  ;;  %375 = vst [vmem:[#allocation2] sm:$0xf] (!%p1182_p2), %v1886_v0 }
  0xf1 PF: > { %v456_v1 = vld [vmem:[%s2244_s10 + $0x8] sm:$0xff]  ;;  %v458_v2 = vld [vmem:[%s2244_s10 + $0x18] sm:$0xff]  ;;  %v455_v3 = vld [vmem:[%s2244_s10] sm:$0xff]  ;;  %s3152_s29 = sld [smem:[#allocation22_spill]]  ;;  %vm962_vm0 = vcmask 1040384  }
  0xf2   : > { %v1324_v4 = vpack.c.bf16 %v458_v2, %v456_v1  ;;  %v819_v5 = vand.u32 2147483647, %v456_v1  ;;  %v821_v6 = vand.u32 2147483647, %v458_v2  ;;  %v457_v7 = vld [vmem:[%s2244_s10 + $0x10] sm:$0xff]  ;;  %v2275_v8 = vld [vmem:[%s2238_s12 + $0x8] sm:$0xff] }
  0xf3   : > { %v1326_v9 = vpack.c.bf16 %v457_v7, %v455_v3  ;;  %v818_v10 = vand.u32 2147483647, %v455_v3  ;;  %v820_v11 = vand.u32 2147483647, %v457_v7  ;;  %v2278_v12 = vld [vmem:[%s2238_s12 + $0x18] sm:$0xff]  ;;  %v2281_v13 = vld [vmem:[%s2238_s12] sm:$0xff] }
  0xf4   : > { %1325 = vmatprep.subr.bf16.mxu1 %v1324_v4  ;;  %v520_v14 = vand.u32 2147483647, %v2275_v8  ;;  %v522_v15 = vand.u32 2147483647, %v2278_v12  ;;  %v2286_v16 = vld [vmem:[%s2238_s12 + $0x10] sm:$0xff]  ;;  %v2289_v17 = vld [vmem:[%s2244_s10 + $0x28] sm:$0xff]  ;;  %v2291_v18 = vpack.c.bf16 %v821_v6, %v819_v5 }
  0xf5   : > { %1327 = vmatpush1.bf16.xpose.msra.mxu1 %v1326_v9  ;;  %v2293_v19 = vpack.c.bf16 %v820_v11, %v818_v10  ;;  %v519_v20 = vand.u32 2147483647, %v2281_v13  ;;  %v521_v21 = vand.u32 2147483647, %v2286_v16  ;;  %v2300_v23 = vld [vmem:[%s2244_s10 + $0x38] sm:$0xff]  ;;  %v459_v24 = vld [vmem:[%s2244_s10 + $0x20] sm:$0xff] }
  0xf6   : > { %v1196_v25 = vpack.c.bf16 %v522_v15, %v520_v14  ;;  %v1328_v26 = vpack.c.bf16 %v2300_v23, %v2289_v17  ;;  %v461_v27 = vld [vmem:[%s2244_s10 + $0x30] sm:$0xff]  ;;  %v822_v28 = vand.u32 2147483647, %v459_v24  ;;  %v2307_v29 = vld [vmem:[%s2238_s12 + $0x28] sm:$0xff]  ;;  %v2310_v30 = vld [vmem:[%s2238_s12 + $0x38] sm:$0xff] }
  0xf7   : > { %v1198_v32 = vpack.c.bf16 %v521_v21, %v519_v20  ;;  %v824_v33 = vand.u32 2147483647, %v461_v27  ;;  %v524_v34 = vand.u32 2147483647, %v2307_v29  ;;  %v2316_v35 = vld [vmem:[%s2238_s12 + $0x20] sm:$0xff]  ;;  %v2319_v36 = vld [vmem:[%s2238_s12 + $0x30] sm:$0xff]  ;;  %v1330_v38 = vpack.c.bf16 %v461_v27, %v459_v24 }
  0xf8   : > { %1197 = vmatprep.subr.bf16.mxu0 %v1196_v25  ;;  %1329 = vmatprep.subr.bf16.mxu1 %v1328_v26  ;;  %v526_v37 = vand.u32 2147483647, %v2310_v30  ;;  %v523_v39 = vand.u32 2147483647, %v2316_v35  ;;  %v525_v40 = vand.u32 2147483647, %v2319_v36 }
  0xf9   : > { %1199 = vmatpush1.bf16.xpose.msra.mxu0 %v1198_v32  ;;  %v2325_v41 = vld [vmem:[%s2244_s10 + $0x48] sm:$0xff]  ;;  %v2328_v42 = vld [vmem:[%s2244_s10 + $0x58] sm:$0xff]  ;;  %v2330_v43 = vpack.c.bf16 %v824_v33, %v822_v28  ;;  %v463_v50 = vld [vmem:[%s2244_s10 + $0x40] sm:$0xff]  ;;  %v823_v7 = vand.u32 2147483647, %v2289_v17  ;;  %s376_s16 = sshra.s32 %s3152_s29, 2 }
  0xfa   : > { %v1200_v44 = vpack.c.bf16 %v526_v37, %v524_v34  ;;  %v1332_v45 = vpack.c.bf16 %v2328_v42, %v2325_v41  ;;  %v2335_v46 = vld [vmem:[%s2238_s12 + $0x48] sm:$0xff]  ;;  %v2338_v47 = vld [vmem:[%s2238_s12 + $0x58] sm:$0xff]  ;;  %v465_v51 = vld [vmem:[%s2244_s10 + $0x50] sm:$0xff]  ;;  %v1202_v52 = vpack.c.bf16 %v525_v40, %v523_v39  ;;  %v826_v53 = vand.u32 2147483647, %v463_v50  ;;  %s379_s23 = sand.u32 3, %s3152_s29 }
  0xfb   : > { %v528_v48 = vand.u32 2147483647, %v2335_v46  ;;  %v530_v49 = vand.u32 2147483647, %v2338_v47  ;;  %v828_v54 = vand.u32 2147483647, %v465_v51  ;;  %v1334_v0 = vpack.c.bf16 %v465_v51, %v463_v50 }
  0xfc   : > { %1201 = vmatprep.subr.bf16.mxu0 %v1200_v44  ;;  %v2347_v57 = vld [vmem:[%s2238_s12 + $0x40] sm:$0xff]  ;;  %v2350_v58 = vld [vmem:[%s2238_s12 + $0x50] sm:$0xff]  ;;  %v2353_v59 = vld [vmem:[%s2244_s10 + $0x68] sm:$0xff]  ;;  %v825_v11 = vand.u32 2147483647, %v2300_v23  ;;  %s1194_s13 = sshll.u32 %s376_s16, 3 }
  0xfd   : > { %1331 = vmatpush1.bf16.xpose.msra.mxu1 %v1330_v38  ;;  %v1204_v56 = vpack.c.bf16 %v530_v49, %v528_v48  ;;  %v2358_v61 = vld [vmem:[%s2244_s10 + $0x78] sm:$0xff]  ;;  %v2361_v62 = vld [vmem:[%s2238_s12 + $0x68] sm:$0xff]  ;;  %v527_v1 = vand.u32 2147483647, %v2347_v57  ;;  %v529_v2 = vand.u32 2147483647, %v2350_v58  ;;  %v2368_v3 = vpack.c.bf16 %v828_v54, %v826_v53  ;;  %s2557_s24 = sadd.s32 %s1194_s13, %s379_s23 }
  0xfe   : > { %1333 = vmatprep.subr.bf16.mxu1 %v1332_v45  ;;  %v2364_v63 = vld [vmem:[%s2238_s12 + $0x78] sm:$0xff]  ;;  %v1336_v4 = vpack.c.bf16 %v2358_v61, %v2353_v59  ;;  %v532_v5 = vand.u32 2147483647, %v2361_v62  ;;  %v467_v9 = vld [vmem:[%s2244_s10 + $0x60] sm:$0xff]  ;;  %v469_v10 = vld [vmem:[%s2244_s10 + $0x70] sm:$0xff]  ;;  %v2389_v27 = vpack.c.bf16 %v825_v11, %v823_v7  ;;  %s383_s2 = scalar_lea.vmem [#allocation8], %s2557_s24 }
  0xff   : > { %v534_v6 = vand.u32 2147483647, %v2364_v63  ;;  %v1206_v14 = vpack.c.bf16 %v529_v2, %v527_v1  ;;  %v830_v15 = vand.u32 2147483647, %v467_v9  ;;  %v832_v20 = vand.u32 2147483647, %v469_v10 }
 0x100   : > { %v2381_v25 = vld [vmem:[%s2238_s12 + $0x60] sm:$0xff]  ;;  %v2384_v26 = vld [vmem:[%s2238_s12 + $0x70] sm:$0xff]  ;;  %v2387_v17 = vld [vmem:[%s2244_s10 + $0x88] sm:$0xff]  ;;  %v1338_v34 = vpack.c.bf16 %v469_v10, %v467_v9  ;;  %v827_v48 = vand.u32 2147483647, %v2325_v41  ;;  %s385_s25 = scalar_lea.vmem [#allocation9], %s2557_s24 }
 0x101   : > { %1203 = vmatpush1.bf16.xpose.msra.mxu0 %v1202_v52  ;;  %v1208_v24 = vpack.c.bf16 %v534_v6, %v532_v5  ;;  %v2394_v28 = vld [vmem:[%s2244_s10 + $0x98] sm:$0xff]  ;;  %v2397_v32 = vld [vmem:[%s2238_s12 + $0x88] sm:$0xff]  ;;  %v531_v37 = vand.u32 2147483647, %v2381_v25  ;;  %v533_v38 = vand.u32 2147483647, %v2384_v26  ;;  %v2404_v39 = vpack.c.bf16 %v832_v20, %v830_v15 }
 0x102   : > { %1205 = vmatprep.subr.bf16.mxu0 %v1204_v56  ;;  %v2400_v33 = vld [vmem:[%s2238_s12 + $0x98] sm:$0xff]  ;;  %v1340_v40 = vpack.c.bf16 %v2394_v28, %v2387_v17  ;;  %v536_v44 = vand.u32 2147483647, %v2397_v32  ;;  %v471_v49 = vld [vmem:[%s2244_s10 + $0x80] sm:$0xff]  ;;  %v473_v50 = vld [vmem:[%s2244_s10 + $0x90] sm:$0xff]  ;;  %p1185_p9 = scmp.ne.s32.totalorder %s3152_s29, 3 }
 0x103   : > { %v538_v45 = vand.u32 2147483647, %v2400_v33  ;;  %v829_v51 = vand.u32 2147483647, %v2328_v42  ;;  %v1210_v52 = vpack.c.bf16 %v533_v38, %v531_v37  ;;  %v834_v53 = vand.u32 2147483647, %v471_v49 }
 0x104   : > { %v836_v54 = vand.u32 2147483647, %v473_v50  ;;  %v2417_v1 = vld [vmem:[%s2238_s12 + $0x80] sm:$0xff]  ;;  %v2420_v2 = vld [vmem:[%s2238_s12 + $0x90] sm:$0xff]  ;;  %v2423_v41 = vld [vmem:[%s2244_s10 + $0xa8] sm:$0xff]  ;;  %v1342_v9 = vpack.c.bf16 %v473_v50, %v471_v49 }
 0x105   : > { %1335 = vmatpush1.bf16.xpose.msra.mxu1 %v1334_v0  ;;  %v1212_v0 = vpack.c.bf16 %v538_v45, %v536_v44  ;;  %3139 = vst [vmem:[#allocation32_spill] sm:$0xff] %v2417_v1  ;;  %3140 = vst [vmem:[#allocation33_spill] sm:$0xff] %v2420_v2  ;;  %v2430_v5 = vld [vmem:[%s2244_s10 + $0xb8] sm:$0xff]  ;;  %v2433_v6 = vld [vmem:[%s2238_s12 + $0xa8] sm:$0xff]  ;;  %v535_v10 = vand.u32 2147483647, %v2417_v1 }
 0x106   : > { %1337 = vmatprep.subr.bf16.mxu1 %v1336_v4  ;;  %v2425_v4 = vpack.c.bf16 %v829_v51, %v827_v48  ;;  %3141 = vst [vmem:[#allocation34_spill] sm:$0xff] %v2433_v6  ;;  %v2436_v7 = vld [vmem:[%s2238_s12 + $0xb8] sm:$0xff]  ;;  %v537_v11 = vand.u32 2147483647, %v2420_v2  ;;  %v1344_v15 = vpack.c.bf16 %v2430_v5, %v2423_v41  ;;  %v540_v20 = vand.u32 2147483647, %v2433_v6 }
 0x107   : > { %3142 = vst [vmem:[#allocation35_spill] sm:$0xff] %v2436_v7  ;;  %v475_v37 = vld [vmem:[%s2244_s10 + $0xa0] sm:$0xff]  ;;  %v477_v38 = vld [vmem:[%s2244_s10 + $0xb0] sm:$0xff] }
 0x108   : > { %v1214_v44 = vpack.c.bf16 %v537_v11, %v535_v10  ;;  %v838_v45 = vand.u32 2147483647, %v475_v37  ;;  %v840_v48 = vand.u32 2147483647, %v477_v38  ;;  %v2453_v51 = vld [vmem:[%s2238_s12 + $0xa0] sm:$0xff]  ;;  %v1346_v10 = vpack.c.bf16 %v477_v38, %v475_v37  ;;  %v481_v38 = vld [vmem:[%s2244_s10 + $0xd0] sm:$0xff] }
 0x109   : > { %1207 = vmatpush1.bf16.xpose.msra.mxu0 %v1206_v14  ;;  %v2440_v14 = vpack.c.bf16 %v836_v54, %v834_v53  ;;  %3143 = vst [vmem:[#allocation36_spill] sm:$0xff] %v2453_v51  ;;  %v2466_v54 = vld [vmem:[%s2244_s10 + $0xd8] sm:$0xff]  ;;  %v539_v11 = vand.u32 2147483647, %v2453_v51  ;;  %v479_v37 = vld [vmem:[%s2244_s10 + $0xc0] sm:$0xff]  ;;  %v2492_v23 = vld [vmem:[%s2238_s12 + $0xd0] sm:$0xff] }
 0x10a   : > { %1209 = vmatprep.subr.bf16.mxu0 %v1208_v24  ;;  %v542_v24 = vand.u32 2147483647, %v2436_v7  ;;  %v2489_v56 = vld [vmem:[%s2238_s12 + $0xc0] sm:$0xff]  ;;  %3149 = vst [vmem:[#allocation42_spill] sm:$0xff] %v2492_v23  ;;  %v493_v2 = vld [vmem:[%s2244_s10 + $0x130] sm:$0xff] }
 0x10b   : > { %3148 = vst [vmem:[#allocation41_spill] sm:$0xff] %v2489_v56  ;;  %v2526_v31 = vld [vmem:[%s2238_s12 + $0xe0] sm:$0xff] }
 0x10c   : > { %v1216_v50 = vpack.c.bf16 %v542_v24, %v540_v20  ;;  %v2476_v20 = vpack.c.bf16 %v840_v48, %v838_v45  ;;  %v837_v45 = vand.u32 2147483647, %v2394_v28  ;;  %3154 = vst [vmem:[#allocation46_spill] sm:$0xff] %v2526_v31 }
 0x10d   : > { %1339 = vmatpush1.bf16.xpose.msra.mxu1 %v1338_v34  ;;  %v831_v34 = vand.u32 2147483647, %v2353_v59  ;;  %v2459_v59 = vld [vmem:[%s2244_s10 + $0xc8] sm:$0xff] }
 0x10e   : > { %1341 = vmatprep.subr.bf16.mxu1 %v1340_v40  ;;  %v833_v40 = vand.u32 2147483647, %v2358_v61  ;;  %3147 = vst [vmem:[#allocation40_spill] sm:$0xff] %v2476_v20  ;;  %v1348_v24 = vpack.c.bf16 %v2466_v54, %v2459_v59  ;;  %v844_v61 = vand.u32 2147483647, %v481_v38  ;;  %v494_v20 = vld [vmem:[%s2244_s10 + $0x138] sm:$0xff] }
 0x110   : > { %v2461_v53 = vpack.c.bf16 %v833_v40, %v831_v34 }
 0x111   : > { %1211 = vmatpush1.bf16.xpose.msra.mxu0 %v1210_v52  ;;  %v2456_v52 = vld [vmem:[%s2238_s12 + $0xb0] sm:$0xff] }
 0x112   : > { %1213 = vmatprep.subr.bf16.mxu0 %v1212_v0  ;;  %3144 = vst [vmem:[#allocation37_spill] sm:$0xff] %v2456_v52  ;;  %v2469_v0 = vld [vmem:[%s2238_s12 + $0xc8] sm:$0xff] }
 0x113   : > { %3145 = vst [vmem:[#allocation38_spill] sm:$0xff] %v2469_v0  ;;  %v544_v34 = vand.u32 2147483647, %v2469_v0  ;;  %v2565_v0 = vld [vmem:[%s2238_s12 + $0x100] sm:$0xff] }
 0x114   : > { %3159 = vst [vmem:[#allocation51_spill] sm:$0xff] %v2565_v0 }
 0x115   : > { %1343 = vmatpush1.bf16.xpose.msra.mxu1 %v1342_v9  ;;  %v2472_v9 = vld [vmem:[%s2238_s12 + $0xd8] sm:$0xff] }
 0x116   : > { %1345 = vmatprep.subr.bf16.mxu1 %v1344_v15  ;;  %3146 = vst [vmem:[#allocation39_spill] sm:$0xff] %v2472_v9  ;;  %v541_v15 = vand.u32 2147483647, %v2456_v52  ;;  %v546_v40 = vand.u32 2147483647, %v2472_v9  ;;  %v2568_v9 = vld [vmem:[%s2238_s12 + $0x110] sm:$0xff] }
 0x117   : > { %3160 = vst [vmem:[#allocation52_spill] sm:$0xff] %v2568_v9  ;;  %v492_v52 = vld [vmem:[%s2244_s10 + $0x128] sm:$0xff] }
 0x118   : > { %v1218_v48 = vpack.c.bf16 %v541_v15, %v539_v11  ;;  %v1220_v42 = vpack.c.bf16 %v546_v40, %v544_v34  ;;  %v2505_v11 = vld [vmem:[%s2238_s12 + $0xe8] sm:$0xff]  ;;  %v2508_v15 = vld [vmem:[%s2238_s12 + $0xf8] sm:$0xff]  ;;  %v543_v34 = vand.u32 2147483647, %v2489_v56  ;;  %v545_v40 = vand.u32 2147483647, %v2492_v23 }
 0x119   : > { %1215 = vmatpush1.bf16.xpose.msra.mxu0 %v1214_v44  ;;  %v835_v44 = vand.u32 2147483647, %v2387_v17  ;;  %v2495_v17 = vld [vmem:[%s2244_s10 + $0xe8] sm:$0xff]  ;;  %3150 = vst [vmem:[#allocation43_spill] sm:$0xff] %v2505_v11  ;;  %3151 = vst [vmem:[#allocation44_spill] sm:$0xff] %v2508_v15 }
 0x11a   : > { %1217 = vmatprep.subr.bf16.mxu0 %v1216_v50  ;;  %v842_v50 = vand.u32 2147483647, %v479_v37  ;;  %v550_v28 = vand.u32 2147483647, %v2508_v15 }
 0x11b   : > { %v2497_v21 = vpack.c.bf16 %v837_v45, %v835_v44  ;;  %v548_v45 = vand.u32 2147483647, %v2505_v11 }
 0x11c   : > { %v2512_v49 = vpack.c.bf16 %v844_v61, %v842_v50  ;;  %v841_v61 = vand.u32 2147483647, %v2430_v5 }
 0x11d   : > { %1347 = vmatpush1.bf16.xpose.msra.mxu1 %v1346_v10  ;;  %v2502_v10 = vld [vmem:[%s2244_s10 + $0xf8] sm:$0xff]  ;;  %v1224_v22 = vpack.c.bf16 %v550_v28, %v548_v45  ;;  %v547_v45 = vand.u32 2147483647, %v2526_v31 }
 0x11e   : > { %1349 = vmatprep.subr.bf16.mxu1 %v1348_v24  ;;  %v1350_v24 = vpack.c.bf16 %v481_v38, %v479_v37  ;;  %3153 = vst [vmem:[#allocation45_spill] sm:$0xff] %v2512_v49  ;;  %v1352_v44 = vpack.c.bf16 %v2502_v10, %v2495_v17  ;;  %v839_v37 = vand.u32 2147483647, %v2423_v41  ;;  %v483_v38 = vld [vmem:[%s2244_s10 + $0xe0] sm:$0xff]  ;;  %v2529_v41 = vld [vmem:[%s2238_s12 + $0xf0] sm:$0xff]  ;;  %v2532_v49 = vld [vmem:[%s2244_s10 + $0x108] sm:$0xff] }
 0x11f   : > { %v846_v50 = vand.u32 2147483647, %v483_v38  ;;  %3155 = vst [vmem:[#allocation47_spill] sm:$0xff] %v2529_v41 }
 0x120   : > { %v2534_v51 = vpack.c.bf16 %v841_v61, %v839_v37  ;;  %v549_v37 = vand.u32 2147483647, %v2529_v41 }
 0x121   : > { %1219 = vmatpush1.bf16.xpose.msra.mxu0 %v1218_v48  ;;  %v485_v48 = vld [vmem:[%s2244_s10 + $0xf0] sm:$0xff] }
 0x122   : > { %1221 = vmatprep.subr.bf16.mxu0 %v1220_v42  ;;  %v1222_v42 = vpack.c.bf16 %v545_v40, %v543_v34  ;;  %v848_v60 = vand.u32 2147483647, %v485_v48  ;;  %v2542_v34 = vld [vmem:[%s2238_s12 + $0x108] sm:$0xff]  ;;  %v2545_v40 = vld [vmem:[%s2238_s12 + $0x118] sm:$0xff]  ;;  %v1354_v28 = vpack.c.bf16 %v485_v48, %v483_v38  ;;  %v487_v48 = vld [vmem:[%s2244_s10 + $0x100] sm:$0xff] }
 0x123   : > { %3156 = vst [vmem:[#allocation48_spill] sm:$0xff] %v2542_v34  ;;  %3157 = vst [vmem:[#allocation49_spill] sm:$0xff] %v2545_v40  ;;  %v552_v55 = vand.u32 2147483647, %v2542_v34  ;;  %v554_v56 = vand.u32 2147483647, %v2545_v40 }
 0x124   : > { %v2550_v61 = vpack.c.bf16 %v848_v60, %v846_v50  ;;  %v489_v60 = vld [vmem:[%s2244_s10 + $0x110] sm:$0xff]  ;;  %v1226_v50 = vpack.c.bf16 %v549_v37, %v547_v45  ;;  %v2580_v45 = vld [vmem:[%s2238_s12 + $0x128] sm:$0xff]  ;;  %v2583_v37 = vld [vmem:[%s2238_s12 + $0x138] sm:$0xff] }
 0x125   : > { %1351 = vmatpush1.bf16.xpose.msra.mxu1 %v1350_v24  ;;  %v2539_v24 = vld [vmem:[%s2244_s10 + $0x118] sm:$0xff]  ;;  %v852_v23 = vand.u32 2147483647, %v489_v60  ;;  %3162 = vst [vmem:[#allocation54_spill] sm:$0xff] %v2580_v45  ;;  %3163 = vst [vmem:[#allocation55_spill] sm:$0xff] %v2583_v37  ;;  %v495_v34 = vld [vmem:[%s2244_s10 + $0x140] sm:$0xff] }
 0x126   : > { %1353 = vmatprep.subr.bf16.mxu1 %v1352_v44  ;;  %v584_v44 = vlaneseq  ;;  %3158 = vst [vmem:[#allocation50_spill] sm:$0xff] %v2550_v61  ;;  %v1356_v5 = vpack.c.bf16 %v2539_v24, %v2532_v49  ;;  %v850_v61 = vand.u32 2147483647, %v487_v48  ;;  %v556_v41 = vand.u32 2147483647, %v2580_v45  ;;  %v504_v40 = vld [vmem:[%s2244_s10 + $0x188] sm:$0xff] }
 0x127   : > { %v558_v11 = vand.u32 2147483647, %v2583_v37 }
 0x128   : > { %v2559_v38 = vshrl.u32 %v584_v44, 7  ;;  %v1228_v44 = vpack.c.bf16 %v554_v56, %v552_v55  ;;  %v1358_v56 = vpack.c.bf16 %v489_v60, %v487_v48  ;;  %v2590_v31 = vpack.c.bf16 %v852_v23, %v850_v61 }
 0x129   : > { %1223 = vmatpush1.bf16.xpose.msra.mxu0 %v1222_v42  ;;  %v843_v42 = vand.u32 2147483647, %v2459_v59  ;;  %v551_v59 = vand.u32 2147483647, %v2565_v0  ;;  %v849_v48 = vand.u32 2147483647, %v2502_v10 }
 0x12a   : > { %1225 = vmatprep.subr.bf16.mxu0 %v1224_v22  ;;  %v845_v22 = vand.u32 2147483647, %v2466_v54  ;;  %v590_v7 = vsub.s32 1, %v2559_v38  ;;  %v386_v54 = vld [vmem:[%s385_s25] ss:$4 sm:$0x3] }
 0x12b   : > { %3164 = vst [vmem:[#allocation56_spill] sm:$0xff] %v2590_v31  ;;  %v851_v60 = vand.u32 2147483647, %v2532_v49  ;;  %v2624_v31 = vld [vmem:[%s2238_s12 + $0x148] sm:$0xff] }
 0x12c   : > { %v2574_v6 = vpack.c.bf16 %v845_v22, %v843_v42  ;;  %v1360_v42 = vpack.c.bf16 %v494_v20, %v492_v52  ;;  %v384_v22 = vld [vmem:[%s383_s2] ss:$4 sm:$0x3]  ;;  %3167 = vst [vmem:[#allocation59_spill] sm:$0xff] %v2624_v31 }
 0x12d   : > { %1355 = vmatpush1.bf16.xpose.msra.mxu1 %v1354_v28  ;;  %v491_v28 = vld [vmem:[%s2244_s10 + $0x120] sm:$0xff]  ;;  %v387_v15 = vadd.f32 %v386_v54, %v384_v22 }
 0x12e   : > { %1357 = vmatprep.subr.bf16.mxu1 %v1356_v5  ;;  %3161 = vst [vmem:[#allocation53_spill] sm:$0xff] %v2574_v6  ;;  %v553_v5 = vand.u32 2147483647, %v2568_v9  ;;  %v854_v55 = vand.u32 2147483647, %v491_v28  ;;  %v389_v6 = vsub.f32 %v386_v54, %v384_v22  ;;  %v2604_v22 = vld [vmem:[%s2238_s12 + $0x120] sm:$0xff] }
 0x12f   : > { %v2598_v23 = vmul.f32 0.5, %v387_v15  ;;  %v856_v54 = vand.u32 2147483647, %v493_v2  ;;  %3165 = vst [vmem:[#allocation57_spill] sm:$0xff] %v2604_v22  ;;  %v555_v49 = vand.u32 2147483647, %v2604_v22 }
 0x130   : > { %v1230_v1 = vpack.c.bf16 %v553_v5, %v551_v59  ;;  %v2600_v61 = vmul.f32 0.5, %v389_v6  ;;  %v1232_v6 = vpack.c.bf16 %v558_v11, %v556_v41  ;;  %v496_v59 = vld [vmem:[%s2244_s10 + $0x148] sm:$0xff]  ;;  %v855_v41 = vand.u32 2147483647, %v492_v52 }
 0x131   : > { %1227 = vmatpush1.bf16.xpose.msra.mxu0 %v1226_v50  ;;  %v847_v50 = vand.u32 2147483647, %v2495_v17  ;;  %v2607_v17 = vld [vmem:[%s2238_s12 + $0x130] sm:$0xff]  ;;  %v2617_v5 = vrot.slane %v2598_v23, %v590_v7  ;;  %v2635_v15 = vpack.c.bf16 %v856_v54, %v854_v55  ;;  %v858_v52 = vand.u32 2147483647, %v495_v34 }
 0x132   : > { %1229 = vmatprep.subr.bf16.mxu0 %v1228_v44  ;;  %v853_v44 = vand.u32 2147483647, %v2539_v24  ;;  %3166 = vst [vmem:[#allocation58_spill] sm:$0xff] %v2607_v17  ;;  %v2620_v24 = vrot.slane %v2600_v61, %v590_v7  ;;  %v557_v11 = vand.u32 2147483647, %v2607_v17  ;;  %v1362_v7 = vpack.c.bf16 %v493_v2, %v491_v28  ;;  %v497_v2 = vld [vmem:[%s2244_s10 + $0x150] sm:$0xff] }
 0x133   : > { %v2609_v10 = vpack.c.bf16 %v849_v48, %v847_v50  ;;  %v2627_v50 = vld [vmem:[%s2238_s12 + $0x158] sm:$0xff]  ;;  %811 = vmatprep.mubr.f32.mxu1 %v2617_v5  ;;  %3170 = vst [vmem:[#allocation62_spill] sm:$0xff] %v2635_v15  ;;  %v2644_v28 = vld [vmem:[%s2238_s12 + $0x140] sm:$0xff]  ;;  %v2651_v15 = vld [vmem:[%s2238_s12 + $0x150] sm:$0xff] }
 0x134   : > { %3168 = vst [vmem:[#allocation60_spill] sm:$0xff] %v2627_v50  ;;  %v2629_v48 = vpack.c.bf16 %v853_v44, %v851_v60  ;;  %658 = vmatprep.mubr.f32.mxu0 %v2620_v24  ;;  %v560_v44 = vand.u32 2147483647, %v2624_v31  ;;  %v562_v0 = vand.u32 2147483647, %v2627_v50  ;;  %3172 = vst [vmem:[#allocation64_spill] sm:$0xff] %v2644_v28 }
 0x135   : > { %1359 = vmatpush1.bf16.xpose.msra.mxu1 %v1358_v56  ;;  %v498_v56 = vld [vmem:[%s2244_s10 + $0x158] sm:$0xff]  ;;  %3173 = vst [vmem:[#allocation65_spill] sm:$0xff] %v2651_v15  ;;  %v561_v55 = vand.u32 2147483647, %v2651_v15  ;;  %v503_v15 = vld [vmem:[%s2244_s10 + $0x180] sm:$0xff] }
 0x136   : > { %1361 = vmatprep.subr.bf16.mxu1 %v1360_v42  ;;  %3169 = vst [vmem:[#allocation61_spill] sm:$0xff] %v2629_v48  ;;  %v857_v42 = vand.u32 2147483647, %v494_v20  ;;  %v1364_v60 = vpack.c.bf16 %v498_v56, %v496_v59  ;;  %v860_v20 = vand.u32 2147483647, %v497_v2  ;;  %v2784_v48 = vld [vmem:[%s2238_s12 + $0x1e0] sm:$0xff] }
 0x138   : > { %v2639_v9 = vpack.c.bf16 %v857_v42, %v855_v41  ;;  %v500_v41 = vld [vmem:[%s2244_s10 + $0x168] sm:$0xff]  ;;  %v1366_v42 = vpack.c.bf16 %v497_v2, %v495_v34  ;;  %v499_v34 = vld [vmem:[%s2244_s10 + $0x160] sm:$0xff]  ;;  %v501_v2 = vld [vmem:[%s2244_s10 + $0x170] sm:$0xff] }
 0x139   : > { %1231 = vmatpush1.bf16.xpose.msra.mxu0 %v1230_v1  ;;  %v1234_v1 = vpack.c.bf16 %v557_v11, %v555_v49  ;;  %v502_v49 = vld [vmem:[%s2244_s10 + $0x178] sm:$0xff]  ;;  %v2656_v11 = vld [vmem:[%s2238_s12 + $0x168] sm:$0xff]  ;;  %v862_v45 = vand.u32 2147483647, %v499_v34  ;;  %v863_v31 = vand.u32 2147483647, %v500_v41 }
 0x13a   : > { %1233 = vmatprep.subr.bf16.mxu0 %v1232_v6  ;;  %3171 = vst [vmem:[#allocation63_spill] sm:$0xff] %v2639_v9  ;;  %v1236_v6 = vpack.c.bf16 %v562_v0, %v560_v44  ;;  %3174 = vst [vmem:[#allocation66_spill] sm:$0xff] %v2656_v11  ;;  %v559_v9 = vand.u32 2147483647, %v2644_v28  ;;  %v861_v0 = vand.u32 2147483647, %v498_v56  ;;  %v2663_v44 = vpack.c.bf16 %v860_v20, %v858_v52 }
 0x13b   : > { %v1368_v54 = vpack.c.bf16 %v502_v49, %v500_v41  ;;  %v564_v22 = vand.u32 2147483647, %v2656_v11  ;;  %v864_v56 = vand.u32 2147483647, %v501_v2  ;;  %v2672_v52 = vld [vmem:[%s2238_s12 + $0x160] sm:$0xff]  ;;  %v2675_v20 = vld [vmem:[%s2238_s12 + $0x170] sm:$0xff] }
 0x13c   : > { %3176 = vst [vmem:[#allocation68_spill] sm:$0xff] %v2663_v44  ;;  %3178 = vst [vmem:[#allocation70_spill] sm:$0xff] %v2672_v52  ;;  %v865_v50 = vand.u32 2147483647, %v502_v49  ;;  %v866_v41 = vand.u32 2147483647, %v503_v15 }
 0x13d   : > { %1363 = vmatpush1.bf16.xpose.msra.mxu1 %v1362_v7  ;;  %v2659_v7 = vld [vmem:[%s2238_s12 + $0x178] sm:$0xff]  ;;  %3179 = vst [vmem:[#allocation71_spill] sm:$0xff] %v2675_v20  ;;  %v2691_v44 = vpack.c.bf16 %v864_v56, %v862_v45  ;;  %v2700_v49 = vld [vmem:[%s2238_s12 + $0x180] sm:$0xff] }
 0x13e   : > { %1365 = vmatprep.subr.bf16.mxu1 %v1364_v60  ;;  %3175 = vst [vmem:[#allocation67_spill] sm:$0xff] %v2659_v7  ;;  %v859_v60 = vand.u32 2147483647, %v496_v59  ;;  %v566_v17 = vand.u32 2147483647, %v2659_v7  ;;  %v1238_v59 = vpack.c.bf16 %v561_v55, %v559_v9  ;;  %v2687_v9 = vld [vmem:[%s2238_s12 + $0x198] sm:$0xff]  ;;  %v2695_v28 = vpack.c.bf16 %v865_v50, %v863_v31 }
 0x13f   : > { %3181 = vst [vmem:[#allocation73_spill] sm:$0xff] %v2687_v9  ;;  %v563_v55 = vand.u32 2147483647, %v2672_v52  ;;  %3182 = vst [vmem:[#allocation74_spill] sm:$0xff] %v2691_v44  ;;  %v2707_v44 = vld [vmem:[%s2238_s12 + $0x190] sm:$0xff]  ;;  %v508_v31 = vld [vmem:[%s2244_s10 + $0x1a8] sm:$0xff] }
 0x140   : > { %v1240_v37 = vpack.c.bf16 %v566_v17, %v564_v22  ;;  %3183 = vst [vmem:[#allocation75_spill] sm:$0xff] %v2695_v28  ;;  %3184 = vst [vmem:[#allocation76_spill] sm:$0xff] %v2700_v49  ;;  %v510_v50 = vld [vmem:[%s2244_s10 + $0x1b8] sm:$0xff]  ;;  %v567_v28 = vand.u32 2147483647, %v2700_v49 }
 0x141   : > { %1235 = vmatpush1.bf16.xpose.msra.mxu0 %v1234_v1  ;;  %v2668_v1 = vpack.c.bf16 %v861_v0, %v859_v60  ;;  %v506_v60 = vld [vmem:[%s2244_s10 + $0x198] sm:$0xff]  ;;  %v2684_v0 = vld [vmem:[%s2238_s12 + $0x188] sm:$0xff]  ;;  %3185 = vst [vmem:[#allocation77_spill] sm:$0xff] %v2707_v44 }
 0x142   : > { %1237 = vmatprep.subr.bf16.mxu0 %v1236_v6  ;;  %3180 = vst [vmem:[#allocation72_spill] sm:$0xff] %v2684_v0  ;;  %v1370_v6 = vpack.c.bf16 %v501_v2, %v499_v34  ;;  %v1372_v22 = vpack.c.bf16 %v506_v60, %v504_v40  ;;  %v568_v17 = vand.u32 2147483647, %v2684_v0  ;;  %v505_v34 = vld [vmem:[%s2244_s10 + $0x190] sm:$0xff]  ;;  %v1376_v2 = vpack.c.bf16 %v510_v50, %v508_v31 }
 0x143   : > { %3177 = vst [vmem:[#allocation69_spill] sm:$0xff] %v2668_v1  ;;  %v868_v45 = vand.u32 2147483647, %v505_v34  ;;  %v512_v1 = vld [vmem:[%s2244_s10 + $0x1c8] sm:$0xff]  ;;  %v871_v0 = vand.u32 2147483647, %v508_v31 }
 0x145   : > { %1367 = vmatpush1.bf16.xpose.msra.mxu1 %v1366_v42  ;;  %v565_v42 = vand.u32 2147483647, %v2675_v20 }
 0x146   : > { %1369 = vmatprep.subr.bf16.mxu1 %v1368_v54  ;;  %v570_v54 = vand.u32 2147483647, %v2687_v9  ;;  %v873_v9 = vand.u32 2147483647, %v510_v50  ;;  %v2756_v50 = vld [vmem:[%s2238_s12 + $0x1c0] sm:$0xff] }
 0x148   : > { %v1244_v56 = vpack.c.bf16 %v570_v54, %v568_v17  ;;  %v869_v17 = vand.u32 2147483647, %v506_v60  ;;  %v2719_v54 = vpack.c.bf16 %v868_v45, %v866_v41  ;;  %v2728_v41 = vld [vmem:[%s2238_s12 + $0x1a0] sm:$0xff]  ;;  %v2731_v45 = vld [vmem:[%s2238_s12 + $0x1b0] sm:$0xff]  ;;  %v2751_v49 = vpack.c.bf16 %v873_v9, %v871_v0  ;;  %v516_v0 = vld [vmem:[%s2244_s10 + $0x1e8] sm:$0xff] }
 0x149   : > { %1239 = vmatpush1.bf16.xpose.msra.mxu0 %v1238_v59  ;;  %v1242_v59 = vpack.c.bf16 %v565_v42, %v563_v55  ;;  %v2712_v55 = vld [vmem:[%s2238_s12 + $0x1a8] sm:$0xff]  ;;  %v1374_v42 = vpack.c.bf16 %v505_v34, %v503_v15  ;;  %v507_v15 = vld [vmem:[%s2244_s10 + $0x1a0] sm:$0xff]  ;;  %v509_v34 = vld [vmem:[%s2244_s10 + $0x1b0] sm:$0xff]  ;;  %3190 = vst [vmem:[#allocation82_spill] sm:$0xff] %v2728_v41 }
 0x14a   : > { %1241 = vmatprep.subr.bf16.mxu0 %v1240_v37  ;;  %3186 = vst [vmem:[#allocation78_spill] sm:$0xff] %v2712_v55  ;;  %v569_v37 = vand.u32 2147483647, %v2707_v44  ;;  %3188 = vst [vmem:[#allocation80_spill] sm:$0xff] %v2719_v54  ;;  %v572_v52 = vand.u32 2147483647, %v2712_v55 }
 0x14b   : > { %v870_v11 = vand.u32 2147483647, %v507_v15  ;;  %v872_v60 = vand.u32 2147483647, %v509_v34  ;;  %3191 = vst [vmem:[#allocation83_spill] sm:$0xff] %v2731_v45  ;;  %3193 = vst [vmem:[#allocation85_spill] sm:$0xff] %v2751_v49 }
 0x14c   : > { %v511_v44 = vld [vmem:[%s2244_s10 + $0x1c0] sm:$0xff]  ;;  %v518_v9 = vld [vmem:[%s2244_s10 + $0x1f8] sm:$0xff]  ;;  %v575_v49 = vand.u32 2147483647, %v2756_v50 }
 0x14d   : > { %1371 = vmatpush1.bf16.xpose.msra.mxu1 %v1370_v6  ;;  %v2715_v6 = vld [vmem:[%s2238_s12 + $0x1b8] sm:$0xff]  ;;  %v2747_v54 = vpack.c.bf16 %v872_v60, %v870_v11  ;;  %v874_v31 = vand.u32 2147483647, %v511_v44  ;;  %v515_v55 = vld [vmem:[%s2244_s10 + $0x1e0] sm:$0xff] }
 0x14e   : > { %1373 = vmatprep.subr.bf16.mxu1 %v1372_v22  ;;  %3187 = vst [vmem:[#allocation79_spill] sm:$0xff] %v2715_v6  ;;  %v867_v22 = vand.u32 2147483647, %v504_v40  ;;  %v574_v20 = vand.u32 2147483647, %v2715_v6  ;;  %v1246_v40 = vpack.c.bf16 %v569_v37, %v567_v28  ;;  %v2743_v28 = vld [vmem:[%s2238_s12 + $0x1d8] sm:$0xff] }
 0x14f   : > { %v571_v37 = vand.u32 2147483647, %v2728_v41  ;;  %3192 = vst [vmem:[#allocation84_spill] sm:$0xff] %v2747_v54  ;;  %v2763_v54 = vld [vmem:[%s2238_s12 + $0x1d0] sm:$0xff] }
 0x150   : > { %v1248_v7 = vpack.c.bf16 %v574_v20, %v572_v52 }
 0x151   : > { %1243 = vmatpush1.bf16.xpose.msra.mxu0 %v1242_v59  ;;  %v2724_v59 = vpack.c.bf16 %v869_v17, %v867_v22  ;;  %v514_v22 = vld [vmem:[%s2244_s10 + $0x1d8] sm:$0xff]  ;;  %v2740_v17 = vld [vmem:[%s2238_s12 + $0x1c8] sm:$0xff] }
 0x152   : > { %1245 = vmatprep.subr.bf16.mxu0 %v1244_v56  ;;  %v1378_v56 = vpack.c.bf16 %v509_v34, %v507_v15  ;;  %v1380_v52 = vpack.c.bf16 %v514_v22, %v512_v1  ;;  %v576_v20 = vand.u32 2147483647, %v2740_v17  ;;  %v513_v15 = vld [vmem:[%s2244_s10 + $0x1d0] sm:$0xff]  ;;  %v875_v34 = vand.u32 2147483647, %v512_v1 }
 0x153   : > { %3189 = vst [vmem:[#allocation81_spill] sm:$0xff] %v2724_v59  ;;  %v876_v11 = vand.u32 2147483647, %v513_v15  ;;  %v586_v1 = vsub.s32 0, %v2559_v38 }
 0x155   : > { %1375 = vmatpush1.bf16.xpose.msra.mxu1 %v1374_v42  ;;  %v573_v42 = vand.u32 2147483647, %v2731_v45 }
 0x156   : > { %1377 = vmatprep.subr.bf16.mxu1 %v1376_v2  ;;  %v578_v2 = vand.u32 2147483647, %v2743_v28 }
 0x158   : > { %v1252_v60 = vpack.c.bf16 %v578_v2, %v576_v20  ;;  %v2775_v20 = vpack.c.bf16 %v876_v11, %v874_v31  ;;  %v1384_v2 = vpack.c.bf16 %v518_v9, %v516_v0  ;;  %v2791_v11 = vld [vmem:[%s2238_s12 + $0x1f0] sm:$0xff] }
 0x159   : > { %1247 = vmatpush1.bf16.xpose.msra.mxu0 %v1246_v40  ;;  %v1250_v40 = vpack.c.bf16 %v573_v42, %v571_v37  ;;  %v2768_v37 = vld [vmem:[%s2238_s12 + $0x1e8] sm:$0xff]  ;;  %v1382_v42 = vpack.c.bf16 %v513_v15, %v511_v44  ;;  %v517_v44 = vld [vmem:[%s2244_s10 + $0x1f0] sm:$0xff]  ;;  %v878_v15 = vand.u32 2147483647, %v515_v55 }
 0x15a   : > { %1249 = vmatprep.subr.bf16.mxu0 %v1248_v7  ;;  %v577_v7 = vand.u32 2147483647, %v2763_v54  ;;  %3194 = vst [vmem:[#allocation86_spill] sm:$0xff] %v2775_v20  ;;  %v580_v41 = vand.u32 2147483647, %v2768_v37 }
 0x15b   : > { %v880_v59 = vand.u32 2147483647, %v517_v44 }
 0x15d   : > { %1379 = vmatpush1.bf16.xpose.msra.mxu1 %v1378_v56  ;;  %v2771_v56 = vld [vmem:[%s2238_s12 + $0x1f8] sm:$0xff] }
 0x15e   : > { %1381 = vmatprep.subr.bf16.mxu1 %v1380_v52  ;;  %v877_v52 = vand.u32 2147483647, %v514_v22  ;;  %v582_v45 = vand.u32 2147483647, %v2771_v56  ;;  %v1318_v22 = vpack.c.bf16 %v2763_v54, %v2756_v50 }
 0x160   : > { %v2780_v6 = vpack.c.bf16 %v877_v52, %v875_v34  ;;  %v1256_v31 = vpack.c.bf16 %v582_v45, %v580_v41  ;;  %v579_v34 = vand.u32 2147483647, %v2784_v48  ;;  %v2795_v52 = vpack.c.bf16 %v880_v59, %v878_v15  ;;  %v3231_v15 = vld [vmem:[#allocation48_spill] sm:$0xff] }
 0x161   : > { %1251 = vmatpush1.bf16.xpose.msra.mxu0 %v1250_v40  ;;  %v1254_v40 = vpack.c.bf16 %v577_v7, %v575_v49  ;;  %v879_v49 = vand.u32 2147483647, %v516_v0  ;;  %v881_v7 = vand.u32 2147483647, %v518_v9  ;;  %v1320_v41 = vpack.c.bf16 %v2771_v56, %v2768_v37 }
 0x162   : > { %1253 = vmatprep.subr.bf16.mxu0 %v1252_v60  ;;  %v1386_v60 = vpack.c.bf16 %v517_v44, %v515_v55  ;;  %v1322_v55 = vpack.c.bf16 %v2791_v11, %v2784_v48  ;;  %v2806_v45 = vrot.slane %v2598_v23, %v586_v1  ;;  %v3195_v59 = vpack.c.bf16 %v2278_v12, %v2275_v8  ;;  %v3225_v23 = vld [vmem:[#allocation50_spill] sm:$0xff]  ;;  %v3230_v44 = vld [vmem:[#allocation49_spill] sm:$0xff] }
 0x163   : > { %v2797_v20 = vpack.c.bf16 %v881_v7, %v879_v49  ;;  %v2813_v0 = vrot.slane %v2600_v61, %v586_v1  ;;  %v3197_v8 = vpack.c.bf16 %v2310_v30, %v2307_v29  ;;  %v3198_v12 = vpack.c.bf16 %v2319_v36, %v2316_v35  ;;  %v3204_v35 = vld [vmem:[#allocation33_spill] sm:$0xff]  ;;  %v3205_v36 = vld [vmem:[#allocation32_spill] sm:$0xff]  ;;  %v3234_v1 = vld [vmem:[#allocation63_spill] sm:$0xff] }
 0x164   : > { %v3202_v29 = vpack.c.bf16 %v2384_v26, %v2381_v25  ;;  %v3203_v30 = vpack.c.bf16 %v2400_v33, %v2397_v32  ;;  %v3215_v25 = vld [vmem:[#allocation39_spill] sm:$0xff]  ;;  %v3216_v26 = vld [vmem:[#allocation38_spill] sm:$0xff]  ;;  %v3218_v32 = vld [vmem:[#allocation45_spill] sm:$0xff] }
 0x165   : > { %1383 = vmatpush1.bf16.xpose.msra.mxu1 %v1382_v42  ;;  %v581_v42 = vand.u32 2147483647, %v2791_v11  ;;  %v3219_v33 = vld [vmem:[#allocation42_spill] sm:$0xff]  ;;  %v3226_v61 = vld [vmem:[#allocation61_spill] sm:$0xff] }
 0x166   : > { %1385 = vmatprep.subr.bf16.mxu1 %v1384_v2  ;;  %v3239_v49 = vld [vmem:[#allocation54_spill] sm:$0xff] }
 0x167   : > { %v1258_v2 = vpack.c.bf16 %v581_v42, %v579_v34  ;;  %v3238_v42 = vld [vmem:[#allocation55_spill] sm:$0xff] }
 0x168   : > { %v3240_v7 = vpack.c.bf16 %v3238_v42, %v3239_v49 }
 0x169   : > { %1255 = vmatpush1.bf16.xpose.msra.mxu0 %v1254_v40  ;;  %v3232_v40 = vpack.c.bf16 %v3230_v44, %v3231_v15  ;;  %v3277_v44 = vpack.c.bf16 %v2743_v28, %v2740_v17  ;;  %v3278_v15 = vld [vmem:[#allocation86_spill] sm:$0xff]  ;;  %v1887_v28 = vmov 1983009808  }
 0x16a   : > { %1257 = vmatprep.subr.bf16.mxu0 %v1256_v31  ;;  %v3235_v31 = vld [vmem:[#allocation52_spill] sm:$0xff] }
 0x16d   : > { %1387 = vmatpush1.bf16.xpose.msra.mxu1 %v1386_v60  ;;  %v3236_v60 = vld [vmem:[#allocation51_spill] sm:$0xff] }
 0x16e   : > { %1389 = vmatprep.subr.bf16.mxu1 %v2291_v18  ;;  %v3196_v18 = vpack.c.bf16 %v2286_v16, %v2281_v13  ;;  %v3200_v13 = vpack.c.bf16 %v2350_v58, %v2347_v57  ;;  %v3201_v16 = vpack.c.bf16 %v2364_v63, %v2361_v62  ;;  %v3210_v58 = vld [vmem:[#allocation40_spill] sm:$0xff]  ;;  %v3211_v62 = vld [vmem:[#allocation53_spill] sm:$0xff]  ;;  %v3237_v34 = vpack.c.bf16 %v3235_v31, %v3236_v60 }
 0x16f   : > { %v3212_v63 = vld [vmem:[#allocation37_spill] sm:$0xff] }
 0x171   : > { %1259 = vmatpush1.bf16.xpose.msra.mxu0 %v1258_v2  ;;  %v3241_v2 = vld [vmem:[#allocation62_spill] sm:$0xff] }
 0x172   : > { %1261 = vmatprep.subr.bf16.mxu0 %v3195_v59  ;;  %v3242_v59 = vld [vmem:[#allocation69_spill] sm:$0xff] }
 0x174   : > { %812 = vmatmul.mubr.f32.vlgmr.msra.gmra.mrb[0].mxu1 %v2806_v45 }
 0x175   : > { %1391 = vmatpush1.bf16.xpose.msra.mxu1 %v2293_v19  ;;  %946 = vmatprep.mubr.f32.mxu1 %v2620_v24  ;;  %v3199_v19 = vpack.c.bf16 %v2338_v47, %v2335_v46  ;;  %v3207_v46 = vld [vmem:[#allocation35_spill] sm:$0xff]  ;;  %v3208_v47 = vld [vmem:[#allocation34_spill] sm:$0xff] }
 0x176   : > { %1393 = vmatprep.subr.bf16.mxu1 %v2389_v27  ;;  %v3209_v57 = vpack.c.bf16 %v3207_v46, %v3208_v47  ;;  %v3217_v27 = vpack.c.bf16 %v3215_v25, %v3216_v26  ;;  %v3228_v24 = vld [vmem:[#allocation46_spill] sm:$0xff]  ;;  %v3254_v46 = vld [vmem:[#allocation67_spill] sm:$0xff]  ;;  %v3262_v25 = vld [vmem:[#allocation73_spill] sm:$0xff] }
 0x177   : > { %v3255_v47 = vld [vmem:[#allocation66_spill] sm:$0xff]  ;;  %v3263_v26 = vld [vmem:[#allocation72_spill] sm:$0xff] }
 0x178   : > { %659 = vmatmul.mubr.f32.vlgmr.msra.gmra.mrb[0].mxu0 %v2813_v0 }
 0x179   : > { %1263 = vmatpush1.bf16.xpose.msra.mxu0 %v3196_v18  ;;  %740 = vmatprep.mubr.f32.mxu0 %v2617_v5  ;;  %v3227_v5 = vld [vmem:[#allocation47_spill] sm:$0xff]  ;;  %v3243_v18 = vld [vmem:[#allocation58_spill] sm:$0xff] }
 0x17a   : > { %1265 = vmatprep.subr.bf16.mxu0 %v3197_v8  ;;  %v3229_v9 = vpack.c.bf16 %v3227_v5, %v3228_v24  ;;  %v3244_v8 = vld [vmem:[#allocation57_spill] sm:$0xff]  ;;  %v3274_v5 = vld [vmem:[#allocation83_spill] sm:$0xff]  ;;  %v3275_v24 = vld [vmem:[#allocation82_spill] sm:$0xff] }
 0x17d   : > { %1395 = vmatpush1.bf16.xpose.msra.mxu1 %v2330_v43  ;;  %v3206_v43 = vpack.c.bf16 %v3204_v35, %v3205_v36  ;;  %v3251_v35 = vld [vmem:[#allocation65_spill] sm:$0xff]  ;;  %v3252_v36 = vld [vmem:[#allocation64_spill] sm:$0xff] }
 0x17e   : > { %1397 = vmatprep.subr.bf16.mxu1 %v2425_v4 }
 0x181   : > { %1267 = vmatpush1.bf16.xpose.msra.mxu0 %v3198_v12  ;;  %v3245_v12 = vpack.c.bf16 %v3243_v18, %v3244_v8 }
 0x182   : > { %1269 = vmatprep.subr.bf16.mxu0 %v3199_v19  ;;  %v3246_v19 = vld [vmem:[#allocation60_spill] sm:$0xff] }
 0x185   : > { %1399 = vmatpush1.bf16.xpose.msra.mxu1 %v2368_v3  ;;  %v3213_v3 = vld [vmem:[#allocation36_spill] sm:$0xff] }
 0x186   : > { %1401 = vmatprep.subr.bf16.mxu1 %v2461_v53 }
 0x189   : > { %1271 = vmatpush1.bf16.xpose.msra.mxu0 %v3200_v13  ;;  %v3247_v13 = vld [vmem:[#allocation59_spill] sm:$0xff] }
 0x18a   : > { %1273 = vmatprep.subr.bf16.mxu0 %v3201_v16  ;;  %v3248_v16 = vpack.c.bf16 %v3246_v19, %v3247_v13 }
 0x18d   : > { %1403 = vmatpush1.bf16.xpose.msra.mxu1 %v2404_v39  ;;  %v3220_v39 = vld [vmem:[#allocation41_spill] sm:$0xff] }
 0x18e   : > { %1405 = vmatprep.subr.bf16.mxu1 %v2497_v21  ;;  %v3214_v21 = vpack.c.bf16 %v3212_v63, %v3213_v3  ;;  %v3221_v4 = vpack.c.bf16 %v3219_v33, %v3220_v39  ;;  %v3259_v63 = vld [vmem:[#allocation71_spill] sm:$0xff]  ;;  %v3260_v3 = vld [vmem:[#allocation70_spill] sm:$0xff]  ;;  %v3266_v33 = vld [vmem:[#allocation85_spill] sm:$0xff] }
 0x18f   : > { %v3267_v39 = vld [vmem:[#allocation77_spill] sm:$0xff] }
 0x191   : > { %1275 = vmatpush1.bf16.xpose.msra.mxu0 %v3202_v29  ;;  %v3249_v29 = vld [vmem:[#allocation68_spill] sm:$0xff] }
 0x192   : > { %1277 = vmatprep.subr.bf16.mxu0 %v3203_v30  ;;  %v3250_v30 = vld [vmem:[#allocation75_spill] sm:$0xff] }
 0x195   : > { %1407 = vmatpush1.bf16.xpose.msra.mxu1 %v2440_v14  ;;  %v3222_v14 = vld [vmem:[#allocation44_spill] sm:$0xff] }
 0x196   : > { %1409 = vmatprep.subr.bf16.mxu1 %v2534_v51  ;;  %v3223_v51 = vld [vmem:[#allocation43_spill] sm:$0xff] }
 0x197   : > { %v3224_v53 = vpack.c.bf16 %v3222_v14, %v3223_v51  ;;  %v3270_v51 = vld [vmem:[#allocation79_spill] sm:$0xff] }
 0x199   : > { %1279 = vmatpush1.bf16.xpose.msra.mxu0 %v3206_v43  ;;  %v3253_v43 = vpack.c.bf16 %v3251_v35, %v3252_v36 }
 0x19a   : > { %1281 = vmatprep.subr.bf16.mxu0 %v3209_v57  ;;  %v3256_v57 = vpack.c.bf16 %v3254_v46, %v3255_v47 }
 0x19d   : > { %1411 = vmatpush1.bf16.xpose.msra.mxu1 %v3210_v58  ;;  %v3257_v58 = vld [vmem:[#allocation74_spill] sm:$0xff] }
 0x19e   : > { %1413 = vmatprep.subr.bf16.mxu1 %v3211_v62  ;;  %v3258_v62 = vld [vmem:[#allocation81_spill] sm:$0xff] }
 0x1a1   : > { %1283 = vmatpush1.bf16.xpose.msra.mxu0 %v3214_v21  ;;  %v3261_v21 = vpack.c.bf16 %v3259_v63, %v3260_v3 }
 0x1a2   : > { %1285 = vmatprep.subr.bf16.mxu0 %v3217_v27  ;;  %v3264_v27 = vpack.c.bf16 %v3262_v25, %v3263_v26 }
 0x1a5   : > { %1415 = vmatpush1.bf16.xpose.msra.mxu1 %v3218_v32  ;;  %v3265_v32 = vld [vmem:[#allocation80_spill] sm:$0xff] }
 0x1a6   : > { %1417 = vmatprep.subr.bf16.mxu1 %v2609_v10  ;;  %v3233_v10 = vld [vmem:[#allocation56_spill] sm:$0xff] }
 0x1a9   : > { %1287 = vmatpush1.bf16.xpose.msra.mxu0 %v3221_v4  ;;  %v3268_v4 = vld [vmem:[#allocation76_spill] sm:$0xff] }
 0x1aa   : > { %1289 = vmatprep.subr.bf16.mxu0 %v3224_v53  ;;  %v3269_v14 = vpack.c.bf16 %v3267_v39, %v3268_v4  ;;  %v3271_v53 = vld [vmem:[#allocation78_spill] sm:$0xff] }
 0x1ad   : > { %1419 = vmatpush1.bf16.xpose.msra.mxu1 %v3225_v23  ;;  %v3272_v23 = vpack.c.bf16 %v3270_v51, %v3271_v53 }
 0x1ae   : > { %1421 = vmatprep.subr.bf16.mxu1 %v3226_v61  ;;  %v3273_v61 = vld [vmem:[#allocation84_spill] sm:$0xff] }
 0x1b1   : > { %1291 = vmatpush1.bf16.xpose.msra.mxu0 %v3229_v9  ;;  %v3276_v9 = vpack.c.bf16 %v3274_v5, %v3275_v24 }
 0x1b2   : > { %1293 = vmatprep.subr.bf16.mxu0 %v3232_v40 }
 0x1b5   : > { %1423 = vmatpush1.bf16.xpose.msra.mxu1 %v3233_v10 }
 0x1b6   : > { %1425 = vmatprep.subr.bf16.mxu1 %v3234_v1 }
 0x1b9   : > { %1295 = vmatpush1.bf16.xpose.msra.mxu0 %v3237_v34  ;;  %v983_v34 = vld [vmem:[%s328_s5] sm:$0xf] (!%p1185_p9) }
 0x1ba   : > { %1297 = vmatprep.subr.bf16.mxu0 %v3240_v7 }
 0x1bd   : > { %1427 = vmatpush1.bf16.xpose.msra.mxu1 %v3241_v2 }
 0x1be   : > { %1429 = vmatprep.subr.bf16.mxu1 %v3242_v59 }
 0x1c1   : > { %1299 = vmatpush1.bf16.xpose.msra.mxu0 %v3245_v12 }
 0x1c2   : > { %1301 = vmatprep.subr.bf16.mxu0 %v3248_v16 }
 0x1c5   : > { %1431 = vmatpush1.bf16.xpose.msra.mxu1 %v3249_v29 }
 0x1c6   : > { %1433 = vmatprep.subr.bf16.mxu1 %v3250_v30 }
 0x1c9   : > { %1303 = vmatpush1.bf16.xpose.msra.mxu0 %v3253_v43 }
 0x1ca   : > { %1305 = vmatprep.subr.bf16.mxu0 %v3256_v57 }
 0x1cd   : > { %1435 = vmatpush1.bf16.xpose.msra.mxu1 %v3257_v58 }
 0x1ce   : > { %1437 = vmatprep.subr.bf16.mxu1 %v3258_v62 }
 0x1d1   : > { %1307 = vmatpush1.bf16.xpose.msra.mxu0 %v3261_v21 }
 0x1d2   : > { %1309 = vmatprep.subr.bf16.mxu0 %v3264_v27 }
 0x1d5   : > { %1439 = vmatpush1.bf16.xpose.msra.mxu1 %v3265_v32 }
 0x1d6   : > { %1441 = vmatprep.subr.bf16.mxu1 %v3266_v33 }
 0x1d9   : > { %1311 = vmatpush1.bf16.xpose.msra.mxu0 %v3269_v14 }
 0x1da   : > { %1313 = vmatprep.subr.bf16.mxu0 %v3272_v23 }
 0x1dd   : > { %1443 = vmatpush1.bf16.xpose.msra.mxu1 %v3273_v61 }
 0x1de   : > { %1445 = vmatprep.subr.bf16.mxu1 %v2780_v6 }
 0x1e1   : > { %1315 = vmatpush1.bf16.xpose.msra.mxu0 %v3276_v9 }
 0x1e2   : > { %1317 = vmatprep.subr.bf16.mxu0 %v3277_v44 }
 0x1e5   : > { %1447 = vmatpush1.bf16.xpose.msra.mxu1 %v3278_v15 }
 0x1e6   : > { %1449 = vmatprep.subr.bf16.mxu1 %v2797_v20  ;;  %v969_v20 = vunpack.c.l.s4 %v1887_v28 }
 0x1e8   : > { %v970_v37 = vunpack.c.0.s8 %v969_v20 }
 0x1e9   : > { %1319 = vmatpush1.bf16.xpose.msra.mxu0 %v1318_v22 }
 0x1ea   : > { %1321 = vmatprep.subr.bf16.mxu0 %v1320_v41  ;;  %v973_v11 = vsub.s32 %v970_v37, %v2559_v38 }
 0x1ed   : > { %1451 = vmatpush1.bf16.xpose.msra.mxu1 %v2795_v52 }
 0x1f1   : > { %1323 = vmatpush1.bf16.xpose.msra.mxu0 %v1322_v55 }
 0x1f4   : > { %947 = vmatmul.mubr.f32.vlgmr.msra.gmra.mrb[2].mxu1 %v2813_v0 }
 0x1f8   : > { %741 = vmatmul.mubr.f32.vlgmr.msra.gmra.mrb[0].mxu0 %v2806_v45  ;;  %v955_v45 = vld [vmem:[#allocation2] sm:$0xf] }
 0x247   : > { %v813_v6 = vpop.f32.mrb[0].mxu1 }
 0x248   : > { %v815_v17 = vpop.f32.mrb[1].mxu1 }
 0x2c7   : > { %v948_v54 = vpop.f32.mrb[2].mxu1 }
 0x2c8   : > { %v953_v50 = vsub.f32 %v813_v6, %v948_v54  ;;  %v950_v22 = vpop.f32.mrb[3].mxu1 }
 0x2c9   : > { %v954_v40 = vsub.f32 %v815_v17, %v950_v22 }
 0x2cb   : > { %v742_v56 = vpop.f32.mrb[0].mxu0 }
 0x2cc   : > { %v958_v52 = vrot.slane %v742_v56, 7  ;;  %v744_v41 = vpop.f32.mrb[1].mxu0 }
 0x2cd   : > { %v959_v10 = vrot.slane %v744_v41, 7 }
 0x2ce   : > { %v963_v48 = vsel %vm962_vm0, %v953_v50, %v958_v52 }
 0x2cf   : > { %v964_v55 = vsel %vm962_vm0, %v954_v40, %v959_v10 }
 0x2d0   : > { %v967_v0 = vcombine.low %v963_v48, %v964_v55  ;;  %981 = sbr.rel (%p1185_p9) target bundleno = 737 (0x2e1), region = 68 }
 0x2d2   : > { %v974_v1 = vrot.slane %v967_v0, %v973_v11 }
 0x2d4   : > { %v976_v31 = vadd.f32 %v974_v1, %v955_v45 }
 0x2d6   : > { %977 = vst [vmem:[#allocation2] sm:$0xf] %v976_v31 }
 0x2dd   : > { %v982_v60 = vld [vmem:[#allocation2] sm:$0xf] }
 0x2de   : > { %v984_v42 = vadd.f32 %v983_v34, %v982_v60 }
 0x2e0   : > { %985 = vst [vmem:[%s364_s9] sm:$0xf] %v984_v42 }
 0x2e1 PF: > { %s3279_s4 = sld [smem:[#allocation23_spill]]  ;;  %s3280_s14 = sld [smem:[#allocation90_spill]] }
 0x2e2   : > { %s1001_s12 = sshll.u32 %s364_s9, 4  ;;  %s987_s0 = scalar_lea.sflag [#allocation5], %s326_s30  ;;  %s1002_s12 = int_to_ptr.vmem [resolvable:$true] %s1001_s12 }
 0x2e3   : > { %s1738_s10 = scalar_lea.vmem %s1002_s12, 64  ;;  %p3281_p4 = scmp.ne.s32.totalorder %s3123_s7, 0 }
 0x2e4   : > { %p1739_p13 = scmp.ne.s32.totalorder %s1002_s12, %s1738_s10  ;;  %s1888_s21 = smov [#allocation12]  }
 0x2e5   : > { %s1742_s5 = sshll.u32 %s1888_s21, 4  ;;  %s1743_s5 = int_to_ptr.vmem [resolvable:$false] %s1742_s5 }
 0x2e6   : > { %p1740_p12 = pnand %p1739_p13, %p3281_p4  ;;  %s1744_s6 = scalar_lea.vmem %s1743_s5, 128 }
 0x2e7   : > { %s1195_s8 = sshll.u32 %s3279_s4, 6  ;;  %p1745_p7 = scmp.lt.s32.totalorder %s1002_s12, %s1743_s5 }
 0x2e8   : > { %s2954_s18 = scalar_lea.hbm %s3280_s14, %s1195_s8  ;;  %p1741_p3 = pneg %p1740_p12 }
 0x2e9   : > { %p1746_p5 = scmp.lt.s32.totalorder %s1744_s6, %s1738_s10 }
 0x2eb   : > { %p1747_p11 = por %p1746_p5, %p1745_p7 }
 0x2ed   : > { %p1748_p0 = pnand %p1747_p11, %p1741_p3 }
 0x2ef   : > { %1751 = shalt.err (!%p1748_p0)
}
 0x2f0   : > { %s1752_s30 = scalar_lea.hbm %s2954_s18, 64  ;;  %s1756_s29 = scalar_lea.hbm %s3280_s14, 128 }
 0x2f1   : > { %p1753_p10 = scmp.ne.s32.totalorder %s2954_s18, %s1752_s30  ;;  %p1757_p6 = scmp.lt.u32.totalorder %s2954_s18, %s3280_s14 }
 0x2f2   : > { %p1758_p2 = scmp.lt.u32.totalorder %s1756_s29, %s1752_s30  ;;  %p1760_p13 = scmp.lt.u32.totalorder %s1752_s30, %s2954_s18 }
 0x2f3   : > { %p1754_p1 = pnand %p1753_p10, %p3281_p4 }
 0x2f4   : > { %p1759_p9 = por %p1758_p2, %p1757_p6 }
 0x2f5   : > { %p1755_p8 = pneg %p1754_p1 }
 0x2f6   : > { %p1761_p12 = por %p1760_p13, %p1759_p9 }
 0x2f8   : > { %p1762_p3 = pnand %p1761_p12, %p1755_p8 }
 0x2fa   : > { %1765 = shalt.err (!%p1762_p3)
}
 0x2fb   : > { %1468 = dma.vmem_to_hbm [thread:$0]  (%p3281_p4), %s1002_s12, 64, %s2954_s18, %s987_s0  }
 0x2fc PF: > { %s3282_s13 = sld [smem:[#allocation19_spill]]  ;;  %s3283_s24 = sld [smem:[#allocation27_spill]] }
 0x2fd   : > { %p1496_p7 = scmp.ge.s32.totalorder %s1876_s28, 2 }
 0x302   : > { %s1013_s2 = sand.u32 1, %s3282_s13   ;;  %p3284_p5 = scmp.ne.s32.totalorder %s3283_s24, 0 }
 0x303   : > { %s1014_s25 = scalar_lea.sflag [#allocation5], %s1013_s2 }
 0x304   : > { %p1488_p11 = pnand %p1496_p7, %p3284_p5 }
 0x306   : > { %1831 = dma.done.wait (!%p1488_p11), %s1014_s25, 64  }
 0x307   : > { %1833 = vsyncadd (!%p1488_p11), %s1014_s25, 4294967232  ;;  %s25_s28 = sadd.s32 1, %s1876_s28   ;;  %s3285_s21 = sld [smem:[#allocation20_spill]] }
 0x308   : > { %p22_p0 = scmp.ge.s32.totalorder %s25_s28, 10   ;;  %s3286_s22 = sld [smem:[#allocation21_spill]] }
 0x309   : > { %s3287_s23 = sld [smem:[#allocation31_spill]]  ;;  %s3288_s24 = sld [smem:[#allocation24_spill]] }
 0x30a   : > { %s3289_s26 = sld [smem:[#allocation29_spill]]  ;;  %s3290_s7 = sld [smem:[#allocation30_spill]] }
 0x30b   : > { %s3291_s18 = smov %s1840_s19  ;;  %s3292_s19 = smov %s1844_s20 }
 0x30c   : > { %s3293_s20 = smov %s2189_s15  ;;  %s3294_s25 = smov %s1872_s27 }
 0x30d   :  { %24 = sbr.rel (!%p22_p0) target bundleno = 17 (0x11), region = 127 }
 0x310   : > { %s3295_s27 = smov %s3290_s7 }
 0x314   :  { %1019 = vsyncpa [#allocation4], 1 }
 0x315   :  { %1021 = vsyncpa [#allocation4 + $0x1], 1 }
 0x316   :  { %1022 = vsyncpa [#allocation7], 1 }
 0x317   :  { %1024 = vsyncpa [#allocation7 + $0x1], 1 }
 0x318   :  { %1025 = vsyncpa [#allocation10], 1 }
 0x319   :  { %1026 = vsyncpa [#allocation5], 1 }
 0x31a   :  { %1028 = vsyncpa [#allocation5 + $0x1], 1 }

</bundles_post_ra>
